<compile_context>
chip_gen: v5e
topology: v5e:2x2
jax: 0.10.0
libtpu: 0.0.40
codegen_flags: <defaults>
</compile_context>

<pallas_src>
import functools

import jax
import jax.numpy as jnp
import numpy as np
from jax.experimental import pallas as pl
from jax.experimental.pallas import tpu as pltpu


_INV_SQRT2 = 0.7071067811865476


# ---------------------------------------------------------------------------
# Per-generation configuration helpers
# ---------------------------------------------------------------------------
def _tpu_vmem_capacity_bytes():
    """Physical per-core VMEM; conservative (v7x-sized) fallback if unknown."""
    try:
        info = pltpu.get_tpu_info()
        for name in ("vmem_capacity_bytes", "vmem_size_bytes", "vmem_bytes"):
            cap = getattr(info, name, None)
            if cap:
                return int(cap)
    except Exception:
        pass
    return 64 * 1024 * 1024


def _pick_tile(n, target):
    """Largest tile <= target that divides n and keeps the sublane dim 8-aligned
    (or spans the full dim)."""
    t = min(target, n)
    for cand in range(t, 0, -1):
        if n % cand == 0 and (cand % 8 == 0 or cand == n):
            return cand
    return n


_WEIGHT_SINGLE_BUFFER_OK = None


def _single_buffered_weights_supported():
    """One-time (cached) probe: does pl.Buffered(1) on grid-invariant input
    specs compile + run on this build?  Avoids a silent per-call fallback that
    would double grid-invariant weight VMEM (worst on v7x's 64 MiB)."""
    global _WEIGHT_SINGLE_BUFFER_OK
    if _WEIGHT_SINGLE_BUFFER_OK is not None:
        return _WEIGHT_SINGLE_BUFFER_OK

    def _probe(w_ref, x_ref, o_ref):
        o_ref[...] = x_ref[...] + w_ref[...]

    try:
        w = jnp.ones((8, 128), jnp.float32)
        x = jnp.zeros((2, 8, 128), jnp.float32)
        out = pl.pallas_call(
            _probe,
            out_shape=jax.ShapeDtypeStruct((2, 8, 128), jnp.float32),
            grid=(2,),
            in_specs=[
                pl.BlockSpec((8, 128), lambda i: (0, 0),
                             pipeline_mode=pl.Buffered(1)),
                pl.BlockSpec((1, 8, 128), lambda i: (i, 0, 0)),
            ],
            out_specs=pl.BlockSpec((1, 8, 128), lambda i: (i, 0, 0)),
        )(w, x)
        jax.block_until_ready(out)
        _WEIGHT_SINGLE_BUFFER_OK = True
    except Exception:
        _WEIGHT_SINGLE_BUFFER_OK = False
    return _WEIGHT_SINGLE_BUFFER_OK


def _layernorm(x, gamma, beta, eps):
    mu = jnp.mean(x, axis=-1, keepdims=True)
    xc = x - mu
    var = jnp.mean(xc * xc, axis=-1, keepdims=True)
    return xc * jax.lax.rsqrt(var + eps) * gamma + beta


# ---------------------------------------------------------------------------
# Kernel 1: LN1 + fused QKV projection, token-tiled.  Emits qkv in bf16.
# ---------------------------------------------------------------------------
def _qkv_kernel(x_ref, g1_ref, b1_ref, wqkv_ref, bqkv_ref, qkv_ref, *, eps):
    x = x_ref[0]                                          # (tq1, C) f32
    h = _layernorm(x, g1_ref[0], b1_ref[0], eps)          # f32
    qkv = jnp.dot(h.astype(jnp.bfloat16), wqkv_ref[...],
                  preferred_element_type=jnp.float32) + bqkv_ref[0]
    qkv_ref[0] = qkv.astype(qkv_ref.dtype)


# ---------------------------------------------------------------------------
# Kernel 2: flash attention over kv tiles + proj + residual + LN2 + MLP.
# ---------------------------------------------------------------------------
def _attn_mlp_kernel(x_ref, q_ref, k_ref, v_ref,
                     wproj_ref, bproj_ref, g2_ref, b2_ref,
                     w1_ref, bfc1_ref, w2_ref, bfc2_ref,
                     o_ref, m_scr, l_scr, acc_scr,
                     *, num_heads, scale, eps):
    ki = pl.program_id(2)
    nk = pl.num_programs(2)

    @pl.when(ki == 0)
    def _init():
        m_scr[...] = jnp.full(m_scr.shape, -jnp.inf, jnp.float32)
        l_scr[...] = jnp.zeros(l_scr.shape, jnp.float32)
        acc_scr[...] = jnp.zeros(acc_scr.shape, jnp.float32)

    q = q_ref[0]                                          # (tq, C) bf16
    k = k_ref[0]                                          # (tk, C) bf16
    v = v_ref[0]                                          # (tk, C) bf16
    C = q.shape[-1]
    hd = C // num_heads
    tq_rows = q.shape[0]

    # Read the running state once per kv step (full-width, lane-dense).
    m_prev_full = m_scr[...]                              # (tq, C)
    l_prev_full = l_scr[...]                              # (tq, C)
    acc_prev = acc_scr[...]                               # (tq, C)

    m_parts, l_parts, alpha_parts, pv_parts = [], [], [], []
    # Per-head online softmax.  Heads are static lane slices of the (tokens, C)
    # tiles; all per-head intermediates stay in values and the scratch gets one
    # dense (tq, C) store per array at the end of the step.
    # TODO(synk): evaluate a single batched (H, tq, hd) dot_general per kv step
    # (better MXU fill at hd=64 on v6e/v7x) against the relayout cost.
    for h in range(num_heads):
        lo = h * hd
        sl = slice(lo, lo + hd)
        qh, kh, vh = q[:, sl], k[:, sl], v[:, sl]
        s = jax.lax.dot_general(qh, kh, (((1,), (1,)), ((), ())),
                                preferred_element_type=jnp.float32) * scale  # (tq, tk)
        m_prev = m_prev_full[:, lo:lo + 1]                # (tq, 1)
        l_prev = l_prev_full[:, lo:lo + 1]                # (tq, 1)
        m_new = jnp.maximum(m_prev, jnp.max(s, axis=-1, keepdims=True))
        alpha = jnp.exp(m_prev - m_new)                   # (tq, 1)
        p = jnp.exp(s - m_new)                            # (tq, tk) f32
        l_new = alpha * l_prev + jnp.sum(p, axis=-1, keepdims=True)
        pv = jnp.dot(p.astype(jnp.bfloat16), vh,
                     preferred_element_type=jnp.float32)  # (tq, hd)
        m_parts.append(jnp.broadcast_to(m_new, (tq_rows, hd)))
        l_parts.append(jnp.broadcast_to(l_new, (tq_rows, hd)))
        alpha_parts.append(jnp.broadcast_to(alpha, (tq_rows, hd)))
        pv_parts.append(pv)

    alpha_full = jnp.concatenate(alpha_parts, axis=-1)    # (tq, C)
    pv_full = jnp.concatenate(pv_parts, axis=-1)          # (tq, C)
    l_full = jnp.concatenate(l_parts, axis=-1)            # (tq, C)
    acc_new = alpha_full * acc_prev + pv_full             # (tq, C)

    acc_scr[...] = acc_new                                # single dense stores
    m_scr[...] = jnp.concatenate(m_parts, axis=-1)
    l_scr[...] = l_full

    @pl.when(ki == nk - 1)
    def _finalize():
        # Dense normalization: one EUP reciprocal + one full-width VPU multiply
        # (l_full already holds each head's denominator broadcast to hd lanes).
        attn_out = acc_new * pl.reciprocal(l_full, approx=True)   # (tq, C) f32

        y = jnp.dot(attn_out.astype(jnp.bfloat16), wproj_ref[...],
                    preferred_element_type=jnp.float32) + bproj_ref[0]
        x1 = x_ref[0] + y                                 # residual 1

        h2 = _layernorm(x1, g2_ref[0], b2_ref[0], eps)
        f = jnp.dot(h2.astype(jnp.bfloat16), w1_ref[...],
                    preferred_element_type=jnp.float32) + bfc1_ref[0]
        # Exact (erf) GELU, matching torch.nn.GELU default.
        f = 0.5 * f * (1.0 + jax.lax.erf(f * jnp.float32(_INV_SQRT2)))
        # TODO(synk): tile the MLP hidden dim for ViT-L-sized hidden on v7x to
        # cap the live (tq, hidden) f32 intermediate against 64 MiB VMEM.
        f = jnp.dot(f.astype(jnp.bfloat16), w2_ref[...],
                    preferred_element_type=jnp.float32) + bfc2_ref[0]
        o_ref[0] = (x1 + f).astype(o_ref.dtype)           # residual 2


# ---------------------------------------------------------------------------
# Wrapper
# ---------------------------------------------------------------------------
def _const_spec(arr, grid_rank, single_buffer):
    """Whole-array, grid-invariant BlockSpec (fetched once; 1-deep if supported)."""
    zeros = (0,) * arr.ndim
    if grid_rank == 2:
        index_map = lambda b, i: zeros
    else:
        index_map = lambda b, i, j: zeros
    kwargs = {"pipeline_mode": pl.Buffered(1)} if single_buffer else {}
    return pl.BlockSpec(arr.shape, index_map, **kwargs)


def block_forward(x, params, *, num_heads, eps=1e-6, tq=None, tk=None):
    """x: (B, N, C) float32.  Returns Block(x) (lazy) with PyTorch forward semantics."""
    B, N, C = x.shape
    assert C % num_heads == 0
    hd = C // num_heads
    scale = hd ** (-0.5)
    hidden = params["w1"].shape[1]

    # --------- per-generation tiling / VMEM budget ---------
    vmem_cap = _tpu_vmem_capacity_bytes()
    big_vmem = vmem_cap >= 96 * 1024 * 1024            # v5e/v6e (128 MiB) vs v7x (64 MiB)
    vmem_limit = max(32 * 1024 * 1024,
                     min(vmem_cap * 3 // 4, 100 * 1024 * 1024))

    # kv tile 256 feeds the 256-deep MXUs (v6e/v7x); q tile 128 keeps
    # B * (N // tq) >= 2 so both v7x TensorCores get work on the parallel axes.
    tq = _pick_tile(N, 128 if tq is None else tq)
    tk = _pick_tile(N, 256 if tk is None else tk)
    tq1 = _pick_tile(N, 512 if big_vmem else 256)      # kernel-1 token tile

    single_buffer = _single_buffered_weights_supported()

    def _k2_footprint(tq_, tk_):
        wbytes = 2 * (C * C + 2 * C * hidden) + 4 * (4 * C + hidden)
        wmult = 1 if single_buffer else 2
        tiles = (2 * tq_ * C * 4 + 2 * tq_ * C * 2 + 4 * tk_ * C * 2
                 + 2 * tq_ * C * 4)
        scratch = 3 * tq_ * C * 4
        mlp_tmp = tq_ * hidden * 6
        return wmult * wbytes + tiles + scratch + mlp_tmp

    if _k2_footprint(tq, tk) > int(vmem_limit * 0.6):
        tk = _pick_tile(N, 128)                         # shrink kv tile on tight-VMEM parts

    bf16 = jnp.bfloat16
    wqkv = params["wqkv"].astype(bf16)
    wproj = params["wproj"].astype(bf16)
    w1 = params["w1"].astype(bf16)
    w2 = params["w2"].astype(bf16)

    # ------------------- kernel 1: LN1 + QKV -------------------
    qkv_cost = pl.CostEstimate(
        flops=2 * B * N * C * 3 * C,
        transcendentals=0,
        bytes_accessed=4 * B * N * C + 2 * C * 3 * C + 2 * B * N * 3 * C)
    qkv = pl.pallas_call(
        functools.partial(_qkv_kernel, eps=eps),
        out_shape=jax.ShapeDtypeStruct((B, N, 3 * C), bf16),
        grid=(B, N // tq1),
        in_specs=[
            pl.BlockSpec((1, tq1, C), lambda b, i: (b, i, 0)),
            _const_spec(params["g1"], 2, single_buffer),
            _const_spec(params["b1"], 2, single_buffer),
            _const_spec(wqkv, 2, single_buffer),
            _const_spec(params["bqkv"], 2, single_buffer),
        ],
        out_specs=pl.BlockSpec((1, tq1, 3 * C), lambda b, i: (b, i, 0)),
        compiler_params=pltpu.CompilerParams(
            dimension_semantics=("parallel", "parallel"),
            vmem_limit_bytes=vmem_limit),
        cost_estimate=qkv_cost,
    )(x, params["g1"], params["b1"], wqkv, params["bqkv"])

    # ----------- kernel 2: flash attention + proj + MLP -----------
    attn_cost = pl.CostEstimate(
        flops=B * (4 * N * N * C + 2 * N * C * C + 4 * N * C * hidden),
        transcendentals=B * (num_heads * N * N + N * hidden),
        bytes_accessed=(4 * B * N * C + 2 * B * N * 3 * C * (N // tq)
                        + 2 * (C * C + 2 * C * hidden) + 4 * B * N * C))
    kernel2 = functools.partial(_attn_mlp_kernel, num_heads=num_heads,
                                scale=scale, eps=eps)
    out = pl.pallas_call(
        kernel2,
        out_shape=jax.ShapeDtypeStruct((B, N, C), x.dtype),
        grid=(B, N // tq, N // tk),
        in_specs=[
            pl.BlockSpec((1, tq, C), lambda b, qi, ki: (b, qi, 0)),   # x (residual)
            pl.BlockSpec((1, tq, C), lambda b, qi, ki: (b, qi, 0)),   # q slice of qkv
            pl.BlockSpec((1, tk, C), lambda b, qi, ki: (b, ki, 1)),   # k slice of qkv
            pl.BlockSpec((1, tk, C), lambda b, qi, ki: (b, ki, 2)),   # v slice of qkv
            _const_spec(wproj, 3, single_buffer),
            _const_spec(params["bproj"], 3, single_buffer),
            _const_spec(params["g2"], 3, single_buffer),
            _const_spec(params["b2"], 3, single_buffer),
            _const_spec(w1, 3, single_buffer),
            _const_spec(params["bfc1"], 3, single_buffer),
            _const_spec(w2, 3, single_buffer),
            _const_spec(params["bfc2"], 3, single_buffer),
        ],
        out_specs=pl.BlockSpec((1, tq, C), lambda b, qi, ki: (b, qi, 0)),
        scratch_shapes=[
            pltpu.VMEM((tq, C), jnp.float32),   # running max (per-head, lane-broadcast)
            pltpu.VMEM((tq, C), jnp.float32),   # running sum (per-head, lane-broadcast)
            pltpu.VMEM((tq, C), jnp.float32),   # attention accumulator
        ],
        compiler_params=pltpu.CompilerParams(
            dimension_semantics=("parallel", "parallel", "arbitrary"),
            vmem_limit_bytes=vmem_limit),
        cost_estimate=attn_cost,
    )(x, qkv, qkv, qkv, wproj, params["bproj"], params["g2"], params["b2"],
      w1, params["bfc1"], w2, params["bfc2"])
    return out


# ---------------------------------------------------------------------------
# Pure-JAX f32 reference (same math as the PyTorch module)
# ---------------------------------------------------------------------------
def block_reference(x, params, *, num_heads, eps=1e-6):
    B, N, C = x.shape
    hd = C // num_heads
    scale = hd ** (-0.5)

    def ln(z, g, b):
        mu = jnp.mean(z, axis=-1, keepdims=True)
        zc = z - mu
        var = jnp.mean(zc * zc, axis=-1, keepdims=True)
        return zc * jax.lax.rsqrt(var + eps) * g[0] + b[0]

    h = ln(x, params["g1"], params["b1"])
    qkv = h @ params["wqkv"] + params["bqkv"][0]                  # (B, N, 3C)
    qkv = qkv.reshape(B, N, 3, num_heads, hd).transpose(2, 0, 3, 1, 4)
    q, k, v = qkv[0], qkv[1], qkv[2]                              # (B, H, N, hd)
    attn = jnp.einsum('bhnd,bhmd->bhnm', q, k) * scale
    attn = jax.nn.softmax(attn, axis=-1)
    out = jnp.einsum('bhnm,bhmd->bhnd', attn, v)
    out = out.transpose(0, 2, 1, 3).reshape(B, N, C)
    out = out @ params["wproj"] + params["bproj"][0]
    x1 = x + out

    h2 = ln(x1, params["g2"], params["b2"])
    f = h2 @ params["w1"] + params["bfc1"][0]
    f = 0.5 * f * (1.0 + jax.lax.erf(f * jnp.float32(_INV_SQRT2)))
    f = f @ params["w2"] + params["bfc2"][0]
    return x1 + f


def make_params(key, dim, num_heads, mlp_ratio=4.0, qkv_bias=False):
    hidden = int(dim * mlp_ratio)
    ks = jax.random.split(key, 8)
    s = 0.02

    def nrm(k, shape):
        return (s * jax.random.normal(k, shape)).astype(jnp.float32)

    return {
        # LayerNorm params (torch default init: gamma=1, beta=0)
        "g1": jnp.ones((1, dim), jnp.float32),
        "b1": jnp.zeros((1, dim), jnp.float32),
        "g2": jnp.ones((1, dim), jnp.float32),
        "b2": jnp.zeros((1, dim), jnp.float32),
        # Attention
        "wqkv": nrm(ks[0], (dim, 3 * dim)),
        "bqkv": (nrm(ks[1], (1, 3 * dim)) if qkv_bias
                 else jnp.zeros((1, 3 * dim), jnp.float32)),   # qkv_bias=False default
        "wproj": nrm(ks[2], (dim, dim)),
        "bproj": nrm(ks[3], (1, dim)),
        # MLP
        "w1": nrm(ks[4], (dim, hidden)),
        "bfc1": nrm(ks[5], (1, hidden)),
        "w2": nrm(ks[6], (hidden, dim)),
        "bfc2": nrm(ks[7], (1, dim)),
    }


if __name__ == "__main__":
    # TPU-aligned small shapes: C multiple of 128, N large enough that the
    # q-tile and kv-tile grid axes both iterate (N//tq=4, N//tk=2 with defaults),
    # exercising the streamed online-softmax path and the megacore parallel axes.
    B, N, C = 2, 512, 128
    num_heads = 2   # head_dim = 64

    key = jax.random.PRNGKey(0)
    kx, kp = jax.random.split(key)
    x = jax.random.normal(kx, (B, N, C), dtype=jnp.float32)
    params = make_params(kp, C, num_heads)

    out = jax.block_until_ready(block_forward(x, params, num_heads=num_heads))

    ref = jax.block_until_ready(block_reference(x, params, num_heads=num_heads))
    # Loose tolerance: kernel feeds the MXU bf16 operands (f32 accumulation) and
    # stores the qkv intermediate in bf16; the reference is pure f32.
    np.testing.assert_allclose(np.asarray(out), np.asarray(ref), rtol=2e-2, atol=2e-2)

    print("KERNEL_OK")
</pallas_src>

<mosaic_0001>
module attributes {stable_mosaic.version = 11 : i64} {
  func.func @_probe(%arg0: i32, %arg1: memref<8x128xf32, #tpu.memory_space<vmem>>, %arg2: memref<1x8x128xf32, #tpu.memory_space<vmem>>, %arg3: memref<1x8x128xf32, #tpu.memory_space<vmem>>) attributes {dimension_semantics = [#tpu.dimension_semantics<arbitrary>], iteration_bounds = array<i64: 2>, scalar_prefetch = 0 : i64, scratch_operands = 0 : i64, tpu.core_type = #tpu.core_type<tc>, window_params = [{pipeline_mode = #tpu.pipeline_mode<synchronous>, transform_indices = @transform_0, window_bounds = array<i64: 8, 128>}, {transform_indices = @transform_1, window_bounds = array<i64: 1, 8, 128>}, {transform_indices = @transform_2, window_bounds = array<i64: 1, 8, 128>}]} {
    %c0 = arith.constant 0 : index
    %c0_0 = arith.constant 0 : index
    %c0_1 = arith.constant 0 : index
    %0 = vector.load %arg2[%c0, %c0_0, %c0_1] : memref<1x8x128xf32, #tpu.memory_space<vmem>>, vector<1x8x128xf32>
    %c0_2 = arith.constant 0 : index
    %c0_3 = arith.constant 0 : index
    %1 = vector.load %arg1[%c0_2, %c0_3] : memref<8x128xf32, #tpu.memory_space<vmem>>, vector<8x128xf32>
    %2 = vector.shape_cast %1 : vector<8x128xf32> to vector<1x8x128xf32>
    %3 = arith.addf %0, %2 : vector<1x8x128xf32>
    %c0_4 = arith.constant 0 : index
    %c0_5 = arith.constant 0 : index
    %c0_6 = arith.constant 0 : index
    %4 = vector.load %arg3[%c0_4, %c0_5, %c0_6] : memref<1x8x128xf32, #tpu.memory_space<vmem>>, vector<1x8x128xf32>
    tpu.vector_store %arg3[%c0_4, %c0_5, %c0_6], %3 {strides = array<i32>} : memref<1x8x128xf32, #tpu.memory_space<vmem>>, vector<1x8x128xf32>,
    return
  }
  func.func @transform_0(%arg0: i32) -> (i32, i32) {
    %c0_i32 = arith.constant 0 : i32
    %c0_i32_0 = arith.constant 0 : i32
    %c0_i32_1 = arith.constant 0 : i32
    return %c0_i32, %c0_i32_0 : i32, i32
  }
  func.func @transform_1(%arg0: i32) -> (i32, i32, i32) {
    %c0_i32 = arith.constant 0 : i32
    %c0_i32_0 = arith.constant 0 : i32
    %c0_i32_1 = arith.constant 0 : i32
    return %arg0, %c0_i32, %c0_i32_0 : i32, i32, i32
  }
  func.func @transform_2(%arg0: i32) -> (i32, i32, i32) {
    %c0_i32 = arith.constant 0 : i32
    %c0_i32_0 = arith.constant 0 : i32
    %c0_i32_1 = arith.constant 0 : i32
    return %arg0, %c0_i32, %c0_i32_0 : i32, i32, i32
  }
}

module attributes {stable_mosaic.version = 11 : i64} {
  func.func @_qkv_kernel(%arg0: i32, %arg1: i32, %arg2: memref<1x256x128xf32, #tpu.memory_space<vmem>>, %arg3: memref<1x128xf32, #tpu.memory_space<vmem>>, %arg4: memref<1x128xf32, #tpu.memory_space<vmem>>, %arg5: memref<128x384xbf16, #tpu.memory_space<vmem>>, %arg6: memref<1x384xf32, #tpu.memory_space<vmem>>, %arg7: memref<1x256x384xbf16, #tpu.memory_space<vmem>>) attributes {dimension_semantics = [#tpu.dimension_semantics<parallel>, #tpu.dimension_semantics<parallel>], iteration_bounds = array<i64: 2, 2>, scalar_prefetch = 0 : i64, scratch_operands = 0 : i64, tpu.core_type = #tpu.core_type<tc>, window_params = [{transform_indices = @transform_0, window_bounds = array<i64: 1, 256, 128>}, {pipeline_mode = #tpu.pipeline_mode<synchronous>, transform_indices = @transform_1, window_bounds = array<i64: 1, 128>}, {pipeline_mode = #tpu.pipeline_mode<synchronous>, transform_indices = @transform_2, window_bounds = array<i64: 1, 128>}, {pipeline_mode = #tpu.pipeline_mode<synchronous>, transform_indices = @transform_3, window_bounds = array<i64: 128, 384>}, {pipeline_mode = #tpu.pipeline_mode<synchronous>, transform_indices = @transform_4, window_bounds = array<i64: 1, 384>}, {transform_indices = @transform_5, window_bounds = array<i64: 1, 256, 384>}]} {
    %c0 = arith.constant 0 : index
    %c0_0 = arith.constant 0 : index
    %c0_1 = arith.constant 0 : index
    %0 = vector.load %arg2[%c0, %c0_0, %c0_1] : memref<1x256x128xf32, #tpu.memory_space<vmem>>, vector<1x256x128xf32>
    %1 = vector.shape_cast %0 : vector<1x256x128xf32> to vector<256x128xf32>
    %c0_2 = arith.constant 0 : index
    %c0_3 = arith.constant 0 : index
    %2 = vector.load %arg3[%c0_2, %c0_3] : memref<1x128xf32, #tpu.memory_space<vmem>>, vector<1x128xf32>
    %3 = vector.shape_cast %2 : vector<1x128xf32> to vector<128xf32>
    %c0_4 = arith.constant 0 : index
    %c0_5 = arith.constant 0 : index
    %4 = vector.load %arg4[%c0_4, %c0_5] : memref<1x128xf32, #tpu.memory_space<vmem>>, vector<1x128xf32>
    %5 = vector.shape_cast %4 : vector<1x128xf32> to vector<128xf32>
    %cst = arith.constant dense<0.000000e+00> : vector<256xf32>
    %6 = vector.multi_reduction <add>, %1, %cst [1] : vector<256x128xf32> to vector<256xf32>
    %7 = vector.shape_cast %6 : vector<256xf32> to vector<256x1xf32>
    %cst_6 = arith.constant 1.280000e+02 : f32
    %8 = vector.broadcast %cst_6 : f32 to vector<256x1xf32>
    %9 = arith.divf %7, %8 : vector<256x1xf32>
    %10 = vector.broadcast %9 : vector<256x1xf32> to vector<256x128xf32>
    %11 = arith.subf %1, %10 : vector<256x128xf32>
    %12 = arith.mulf %11, %11 : vector<256x128xf32>
    %cst_7 = arith.constant dense<0.000000e+00> : vector<256xf32>
    %13 = vector.multi_reduction <add>, %12, %cst_7 [1] : vector<256x128xf32> to vector<256xf32>
    %14 = vector.shape_cast %13 : vector<256xf32> to vector<256x1xf32>
    %cst_8 = arith.constant 1.280000e+02 : f32
    %15 = vector.broadcast %cst_8 : f32 to vector<256x1xf32>
    %16 = arith.divf %14, %15 : vector<256x1xf32>
    %cst_9 = arith.constant 9.99999997E-7 : f32
    %17 = vector.broadcast %cst_9 : f32 to vector<256x1xf32>
    %18 = arith.addf %16, %17 : vector<256x1xf32>
    %19 = math.rsqrt %18 : vector<256x1xf32>
    %20 = vector.broadcast %19 : vector<256x1xf32> to vector<256x128xf32>
    %21 = arith.mulf %11, %20 : vector<256x128xf32>
    %22 = vector.shape_cast %3 : vector<128xf32> to vector<1x128xf32>
    %23 = vector.broadcast %22 : vector<1x128xf32> to vector<256x128xf32>
    %24 = arith.mulf %21, %23 : vector<256x128xf32>
    %25 = vector.shape_cast %5 : vector<128xf32> to vector<1x128xf32>
    %26 = vector.broadcast %25 : vector<1x128xf32> to vector<256x128xf32>
    %27 = arith.addf %24, %26 : vector<256x128xf32>
    %28 = arith.truncf %27 : vector<256x128xf32> to vector<256x128xbf16>
    %c0_10 = arith.constant 0 : index
    %c0_11 = arith.constant 0 : index
    %29 = vector.load %arg5[%c0_10, %c0_11] : memref<128x384xbf16, #tpu.memory_space<vmem>>, vector<128x384xbf16>
    %cst_12 = arith.constant dense<0.000000e+00> : vector<256x384xf32>
    %30 = tpu.matmul %28, %29, %cst_12 {dimension_numbers = #tpu.dot_dimension_numbers<[1], [0], [0], [1], [0, 0, 1, 1], [], []>} : vector<256x128xbf16>, vector<128x384xbf16>, vector<256x384xf32> -> vector<256x384xf32>
    %c0_13 = arith.constant 0 : index
    %c0_14 = arith.constant 0 : index
    %31 = vector.load %arg6[%c0_13, %c0_14] : memref<1x384xf32, #tpu.memory_space<vmem>>, vector<1x384xf32>
    %32 = vector.shape_cast %31 : vector<1x384xf32> to vector<384xf32>
    %33 = vector.shape_cast %32 : vector<384xf32> to vector<1x384xf32>
    %34 = vector.broadcast %33 : vector<1x384xf32> to vector<256x384xf32>
    %35 = arith.addf %30, %34 : vector<256x384xf32>
    %36 = arith.truncf %35 : vector<256x384xf32> to vector<256x384xbf16>
    %c0_15 = arith.constant 0 : index
    %c0_16 = arith.constant 0 : index
    %c0_17 = arith.constant 0 : index
    %37 = vector.load %arg7[%c0_15, %c0_16, %c0_17] : memref<1x256x384xbf16, #tpu.memory_space<vmem>>, vector<1x256x384xbf16>
    %38 = vector.shape_cast %37 : vector<1x256x384xbf16> to vector<256x384xbf16>
    %39 = vector.shape_cast %36 : vector<256x384xbf16> to vector<1x256x384xbf16>
    tpu.vector_store %arg7[%c0_15, %c0_16, %c0_17], %39 {strides = array<i32>} : memref<1x256x384xbf16, #tpu.memory_space<vmem>>, vector<1x256x384xbf16>,
    return
  }
  func.func @transform_0(%arg0: i32, %arg1: i32) -> (i32, i32, i32) {
    %c0_i32 = arith.constant 0 : i32
    %c0_i32_0 = arith.constant 0 : i32
    return %arg0, %arg1, %c0_i32 : i32, i32, i32
  }
  func.func @transform_1(%arg0: i32, %arg1: i32) -> (i32, i32) {
    %c0_i32 = arith.constant 0 : i32
    %c0_i32_0 = arith.constant 0 : i32
    %c0_i32_1 = arith.constant 0 : i32
    return %c0_i32, %c0_i32_0 : i32, i32
  }
  func.func @transform_2(%arg0: i32, %arg1: i32) -> (i32, i32) {
    %c0_i32 = arith.constant 0 : i32
    %c0_i32_0 = arith.constant 0 : i32
    %c0_i32_1 = arith.constant 0 : i32
    return %c0_i32, %c0_i32_0 : i32, i32
  }
  func.func @transform_3(%arg0: i32, %arg1: i32) -> (i32, i32) {
    %c0_i32 = arith.constant 0 : i32
    %c0_i32_0 = arith.constant 0 : i32
    %c0_i32_1 = arith.constant 0 : i32
    return %c0_i32, %c0_i32_0 : i32, i32
  }
  func.func @transform_4(%arg0: i32, %arg1: i32) -> (i32, i32) {
    %c0_i32 = arith.constant 0 : i32
    %c0_i32_0 = arith.constant 0 : i32
    %c0_i32_1 = arith.constant 0 : i32
    return %c0_i32, %c0_i32_0 : i32, i32
  }
  func.func @transform_5(%arg0: i32, %arg1: i32) -> (i32, i32, i32) {
    %c0_i32 = arith.constant 0 : i32
    %c0_i32_0 = arith.constant 0 : i32
    return %arg0, %arg1, %c0_i32 : i32, i32, i32
  }
}

</mosaic_0001>

<bundles_post_ra>
// kernel: tpu_custom_call.1
= control target key start
LH: loop header
LB: loop body
LE: loop exit
PB: predicated region body
PF: predicated region fallthrough
CT: control target
= control target key end

     0   :  { %7 = vsyncpa [#allocation3], 0  ;;  %s635_s0 = inlined_call_operand.hbm [shape: f32[8,128], index: 0, kind: input, shape index: {}]   ;;  %s636_s1 = inlined_call_operand.hbm [shape: f32[2,8,128], index: 1, kind: input, shape index: {}]   ;;  %s637_s2 = inlined_call_operand.hbm [shape: f32[2,8,128], index: 2, kind: output, shape index: {}]  }
   0x1   :  { %8 = vsyncpa [#allocation6], 0 }
   0x2   :  { %10 = vsyncpa [#allocation6 + $0x1], 0 }
   0x3   :  { %11 = vsyncpa [#allocation4], 0 }
   0x4   :  { %13 = vsyncpa [#allocation4 + $0x1], 0  ;;  %s497_s9 = smov 0   ;;  %s499_s10 = smov 0  }
   0x5   :  { %s501_s11 = smov 0   ;;  %s503_s12 = smov 0  }
   0x6 LB: > { %s518_s13 = sadd.s32 4294967295, %s479_s12   ;;  %s278_s14 = sadd.s32 4294967294, %s479_s12   ;;  %s479_s12 = sphi %s503_s12, %s647_s12   ;;  %s475_s11 = sphi %s501_s11, %s646_s11   ;;  %s471_s10 = sphi %s499_s10, %s645_s10   ;;  %s467_s9 = sphi %s497_s9, %s644_s9  }
   0x7   : > { %p60_p0 = scmp.ne.s32.totalorder %s471_s10, %s467_s9  ;;  %p61_p1 = scmp.eq.s32.totalorder %s518_s13, 0 }
   0x8   : > { %p84_p2 = scmp.eq.s32.totalorder %s518_s13, 1  ;;  %p90_p3 = scmp.eq.s32.totalorder %s278_s14, 1 }
   0x9   : > { %p527_p4 = por %p61_p1, %p60_p0  ;;  %p279_p5 = scmp.ge.s32.totalorder %s479_s12, 1 }
   0xa   : > { %p532_p6 = por %p90_p3, %p60_p0  ;;  %p97_p7 = scmp.lt.s32.totalorder %s479_s12, 3 }
   0xb   : > { %s109_s19 = sshll.u32 %s635_s0, 4  ;;  %s481_s21 = smov [#allocation2]   ;;  %s110_s19 = int_to_ptr.hbm [resolvable:$true] %s109_s19 }
   0xc   : > { %p540_p8 = pnand %p279_p5, %p97_p7  ;;  %s111_s22 = sshll.u32 %s481_s21, 4  ;;  %s112_s22 = int_to_ptr.vmem [resolvable:$true] %s111_s22 }
   0xd   : > { %s550_s23 = sadd.s32 1, %s479_s12   ;;  %s47_s24 = sadd.s32 1, %s475_s11 }
   0xe   : > { %p300_p10 = pneg %p540_p8  ;;  %s44_s25 = ssub.s32 %s479_s12, %s550_s23 }
   0xf   : > { %p45_p12 = scmp.eq.s32.totalorder %s44_s25, 0  ;;  %p54_p13 = scmp.ne.s32.totalorder %s475_s11, %s471_s10 }
  0x10   : > { %p301_p11 = pnand %p300_p10, %p61_p1  ;;  %p55_p0 = scmp.eq.s32.totalorder %s479_s12, 0 }
  0x11   : > { %s559_s26 = scalar_select %p45_p12, %s475_s11, %s47_s24  }
  0x12   : > { %303 = dma.hbm_to_vmem [thread:$0]  (!%p301_p11), %s110_s19, 128, %s112_s22, [#allocation3]  }
  0x13   : > { %p563_p3 = por %p84_p2, %p54_p13  ;;  %p313_p5 = scmp.lt.s32.totalorder %s479_s12, 2 }
  0x14   : > { %s122_s28 = sand.u32 1, %s475_s11   ;;  %s283_s29 = sshll.u32 %s479_s12, 3 }
  0x15   : > { %p56_p7 = por %p55_p0, %p54_p13  ;;  %s282_s30 = sshll.u32 %s122_s28, 3 }
  0x16   : > { %s130_s5 = scalar_lea.hbm %s636_s1, %s283_s29  ;;  %s126_s7 = scalar_lea.vmem [#allocation5], %s282_s30 }
  0x17   : > { %s132_s6 = sshll.u32 %s130_s5, 4  ;;  %s134_s8 = sshll.u32 %s126_s7, 4  ;;  %s133_s6 = int_to_ptr.hbm [resolvable:$true] %s132_s6  ;;  %s135_s8 = int_to_ptr.vmem [resolvable:$true] %s134_s8 }
  0x18   : > { %p573_p10 = pnand %p313_p5, %p56_p7  ;;  %s123_s17 = scalar_lea.sflag [#allocation6], %s122_s28 }
  0x19   : > { %s379_s18 = sshra.s32 %s133_s6, 4  ;;  %s386_s24 = scalar_lea.hbm %s636_s1, 16  ;;  %s380_s18 = int_to_ptr.hbm [resolvable:$true] %s379_s18 }
  0x1a   : > { %s381_s19 = scalar_lea.hbm %s380_s18, 8  ;;  %p383_p11 = pneg %p573_p10 }
  0x1b   : > { %p382_p2 = scmp.ne.s32.totalorder %s380_s18, %s381_s19  ;;  %p387_p0 = scmp.lt.s32.totalorder %s380_s18, %s636_s1 }
  0x1c   : > { %p388_p5 = scmp.lt.s32.totalorder %s386_s24, %s381_s19 }
  0x1d   : > { %p384_p12 = pnand %p383_p11, %p382_p2 }
  0x1e   : > { %p389_p7 = por %p388_p5, %p387_p0 }
  0x1f   : > { %p385_p13 = pneg %p384_p12 }
  0x21   : > { %p390_p9 = pnand %p389_p7, %p385_p13 }
  0x23   : > { %393 = shalt.err (!%p390_p9)
}
  0x24   : > { %307 = dma.hbm_to_vmem [thread:$0]  (!%p573_p10), %s133_s6, 128, %s135_s8, %s123_s17  }
  0x25   : > { %143 = sbr.rel (%p540_p8) target bundleno = 62 (0x3e), region = 28 }
  0x2a   : > { %454 = dma.done.wait (%p61_p1), [#allocation3], 128  }
  0x2b   : > { %456 = vsyncadd (%p61_p1), [#allocation3], 4294967168  ;;  %s594_s28 = sand.u32 1, %s471_s10  }
  0x2c   : > { %s286_s30 = sshll.u32 %s594_s28, 3  ;;  %s151_s3 = scalar_lea.sflag [#allocation6], %s594_s28 }
  0x2d   : > { %s154_s4 = scalar_lea.vmem [#allocation5], %s286_s30 }
  0x2e   : > { %458 = dma.done.wait (%p527_p4), %s151_s3, 128  }
  0x2f   : > { %460 = vsyncadd (%p527_p4), %s151_s3, 4294967168  ;;  %s289_s20 = sshll.u32 %s518_s13, 3  ;;  %s175_s8 = scalar_lea.vmem [#allocation7], %s286_s30  ;;  %v176_v0 = vld [vmem:[%s154_s4] sm:$0xff]  ;;  %v177_v1 = vld [vmem:[#allocation2] sm:$0xff] }
  0x30   : > { %s191_s7 = scalar_lea.hbm %s637_s2, %s289_s20  ;;  %s193_s14 = sshll.u32 %s175_s8, 4  ;;  %v178_v2 = vadd.f32 %v177_v1, %v176_v0  ;;  %s194_s14 = int_to_ptr.vmem [resolvable:$true] %s193_s14 }
  0x31   : > { %s195_s17 = sshll.u32 %s191_s7, 4  ;;  %s181_s18 = scalar_lea.sflag [#allocation4], %s594_s28  ;;  %s196_s17 = int_to_ptr.hbm [resolvable:$true] %s195_s17 }
  0x32   : > { %179 = vst [vmem:[%s175_s8] sm:$0xff] %v178_v2  ;;  %s423_s15 = sshra.s32 %s196_s17, 4  ;;  %s429_s22 = scalar_lea.hbm %s637_s2, 16  ;;  %s424_s15 = int_to_ptr.hbm [resolvable:$true] %s423_s15 }
  0x33   : > { %s425_s19 = scalar_lea.hbm %s424_s15, 8  ;;  %p430_p9 = scmp.lt.s32.totalorder %s424_s15, %s637_s2 }
  0x34   : > { %p426_p1 = scmp.ne.s32.totalorder %s424_s15, %s425_s19  ;;  %p431_p10 = scmp.lt.s32.totalorder %s429_s22, %s425_s19 }
  0x36   : > { %p427_p4 = pnand %p426_p1, %p563_p3  ;;  %p432_p2 = por %p431_p10, %p430_p9 }
  0x38   : > { %p428_p8 = pneg %p427_p4 }
  0x3a   : > { %p433_p11 = pnand %p432_p2, %p428_p8 }
  0x3c   : > { %436 = shalt.err (!%p433_p11)
}
  0x3d   : > { %298 = dma.vmem_to_hbm [thread:$0]  (%p563_p3), %s194_s14, 128, %s196_s17, %s181_s18  }
  0x3e PF: > { %s207_s29 = sand.u32 1, %s467_s9   ;;  %p643_p12 = scmp.ge.s32.totalorder %s479_s12, 2 }
  0x3f   : > { %s208_s28 = scalar_lea.sflag [#allocation4], %s207_s29 }
  0x40   : > { %p309_p13 = pnand %p643_p12, %p532_p6 }
  0x42   : > { %p310_p0 = pneg %p309_p13 }
  0x44   : > { %462 = dma.done.wait (%p310_p0), %s208_s28, 128  }
  0x45   : > { %464 = vsyncadd (%p310_p0), %s208_s28, 4294967168  ;;  %p16_p5 = scmp.ge.s32.totalorder %s550_s23, 4   ;;  %s644_s9 = smov %s471_s10 }
  0x46   : > { %s645_s10 = smov %s475_s11  ;;  %s646_s11 = smov %s559_s26 }
  0x47   : > { %s647_s12 = smov %s550_s23  ;;  %18 = sbr.rel (!%p16_p5) target bundleno = 6 (0x6), region = 78 }
  0x4c   :  { %214 = vsyncpa [#allocation3], 1 }
  0x4d   :  { %216 = vsyncpa [#allocation3 + $0x1], 1 }
  0x4e   :  { %217 = vsyncpa [#allocation6], 1 }
  0x4f   :  { %219 = vsyncpa [#allocation6 + $0x1], 1 }
  0x50   :  { %220 = vsyncpa [#allocation4], 1 }
  0x51   :  { %222 = vsyncpa [#allocation4 + $0x1], 1 }

// kernel: tpu_custom_call.1
= control target key start
LH: loop header
LB: loop body
LE: loop exit
PB: predicated region body
PF: predicated region fallthrough
CT: control target
= control target key end

     0   :  { %s3628_s0 = inlined_call_operand.hbm [shape: f32[2,512,128], index: 0, kind: input, shape index: {}]   ;;  %s3629_s1 = inlined_call_operand.hbm [shape: f32[1,128], index: 1, kind: input, shape index: {}]   ;;  %s3630_s2 = inlined_call_operand.hbm [shape: f32[1,128], index: 2, kind: input, shape index: {}]   ;;  %s3631_s3 = inlined_call_operand.hbm [shape: bf16[128,384], index: 3, kind: input, shape index: {}]   ;;  %s3632_s4 = inlined_call_operand.vmem [shape: f32[1,384], index: 4, kind: input, shape index: {}]   ;;  %s3633_s5 = inlined_call_operand.hbm [shape: bf16[2,512,384], index: 5, kind: output, shape index: {}]  }
   0x1   :  { %3640 = sst [smem:[#allocation20_spill]] %s3629_s1 }
   0x2   :  { %3641 = sst [smem:[#allocation21_spill]] %s3630_s2 }
   0x3   :  { %3642 = sst [smem:[#allocation22_spill]] %s3631_s3 }
   0x4   :  { %10 = vsyncpa [#allocation3], 0 }
   0x5   :  { %12 = vsyncpa [#allocation3 + $0x1], 0 }
   0x6   :  { %13 = vsyncpa [#allocation6], 0 }
   0x7   :  { %14 = vsyncpa [#allocation9], 0 }
   0x8   :  { %15 = vsyncpa [#allocation4], 0 }
   0x9   :  { %17 = vsyncpa [#allocation4 + $0x1], 0  ;;  %s2401_s18 = smov 0   ;;  %s2403_s19 = smov 0  }
   0xa   :  { %s2405_s20 = smov 0   ;;  %s2407_s21 = smov 0  }
   0xb   :  { %s2409_s22 = smov 0   ;;  %s2411_s23 = smov 0  }
   0xc   :  { %s2413_s24 = smov 0   ;;  %s2415_s25 = smov 0  }
   0xd LB: > { %3643 = sst [smem:[#allocation15_spill]] %s2331_s18  ;;  %s1779_s26 = sadd.s32 4294967295, %s2359_s25   ;;  %s2359_s25 = sphi %s2415_s25, %s23_s25   ;;  %s2355_s24 = sphi %s2413_s24, %s3696_s24   ;;  %s2351_s23 = sphi %s2411_s23, %s3691_s23   ;;  %s2347_s22 = sphi %s2409_s22, %s3695_s22   ;;  %s2343_s21 = sphi %s2407_s21, %s3690_s21   ;;  %s2339_s20 = sphi %s2405_s20, %s3694_s20   ;;  %s2335_s19 = sphi %s2403_s19, %s3693_s19   ;;  %s2331_s18 = sphi %s2401_s18, %s3692_s18  }
   0xe   : > { %3644 = sst [smem:[#allocation16_spill]] %s2351_s23  ;;  %s1780_s27 = sadd.s32 4294967294, %s2359_s25  }
   0xf   : > { %p57_p0 = scmp.ne.s32.totalorder %s2335_s19, %s2331_s18  ;;  %p2445_p1 = scmp.eq.s32.totalorder %s1779_s26, 0 }
  0x10   : > { %p2449_p2 = scmp.eq.s32.totalorder %s1779_s26, 3  ;;  %p173_p3 = scmp.eq.s32.totalorder %s1780_s27, 3 }
  0x11   : > { %p2455_p4 = por %p2445_p1, %p57_p0  ;;  %p1781_p5 = scmp.ge.s32.totalorder %s2359_s25, 1 }
  0x12   : > { %p2460_p6 = por %p173_p3, %p57_p0  ;;  %p180_p7 = scmp.lt.s32.totalorder %s2359_s25, 5 }
  0x13   : > { %s3650_s1 = sld [smem:[#allocation20_spill]]  ;;  %s2361_s11 = smov [#allocation5]  }
  0x14   : > { %s3648_s6 = scalar_select %p2460_p6, 1, 0 }
  0x15   : > { %p2468_p8 = pnand %p1781_p5, %p180_p7  ;;  %s194_s12 = sshll.u32 %s2361_s11, 4  ;;  %s195_s12 = int_to_ptr.vmem [resolvable:$true] %s194_s12 }
  0x16   : > { %3649 = sst [smem:[#allocation17_spill]] %s3648_s6  ;;  %s2362_s7 = smov [#allocation7]  }
  0x17   : > { %p1963_p9 = pneg %p2468_p8  ;;  %s3652_s2 = sld [smem:[#allocation21_spill]] }
  0x18   : > { %s3654_s3 = sld [smem:[#allocation22_spill]]  ;;  %s206_s8 = sshll.u32 %s2362_s7, 4  ;;  %s207_s8 = int_to_ptr.vmem [resolvable:$true] %s206_s8 }
  0x19   : > { %s192_s9 = sshll.u32 %s3650_s1, 4  ;;  %p2479_p10 = pnand %p1963_p9, %p2445_p1  ;;  %s193_s9 = int_to_ptr.hbm [resolvable:$true] %s192_s9 }
  0x1a   : > { %s2363_s11 = smov [#allocation8]   ;;  %s2364_s14 = smov 192  }
  0x1b   : > { %1966 = dma.hbm_to_vmem [thread:$0]  (!%p2479_p10), %s193_s9, 16, %s195_s12, [#allocation6]  }
  0x1c   : > { %s217_s13 = sshll.u32 %s2363_s11, 4  ;;  %s2365_s17 = smov 12   ;;  %s218_s13 = int_to_ptr.vmem [resolvable:$true] %s217_s13 }
  0x1d   : > { %s204_s15 = sshll.u32 %s3652_s2, 4  ;;  %s32_s26 = sadd.s32 1, %s2351_s23  ;;  %s205_s15 = int_to_ptr.hbm [resolvable:$true] %s204_s15 }
  0x1e   : > { %s215_s27 = sshll.u32 %s3654_s3, 4  ;;  %p33_p11 = scmp.ge.s32.totalorder %s32_s26, 2  ;;  %s216_s27 = int_to_ptr.hbm [resolvable:$true] %s215_s27 }
  0x1f   : > { %1969 = dma.hbm_to_vmem [thread:$0]  (!%p2479_p10), %s205_s15, 16, %s207_s8, [#allocation6]  }
  0x20   : > { %1972 = dma.hbm_to_vmem [thread:$0]  (!%p2479_p10), %s216_s27, 3072, %s218_s13, [#allocation9], %s2364_s14, %s2364_s14, %s2365_s17  }
  0x21   : > { %s35_s9 = sadd.s32 1, %s2355_s24  ;;  %s44_s12 = sadd.s32 1, %s2339_s20 }
  0x22   : > { %p51_p12 = scmp.ne.s32.totalorder %s2339_s20, %s2335_s19  ;;  %s3698_s26 = smov (%p33_p11, %s32_s26), 0 }
  0x23   : > { %3655 = sst [smem:[#allocation18_spill]] %s3698_s26  ;;  %s3700_s9 = smov (!%p33_p11, %s35_s9), %s2355_s24 }
  0x24   : > { %s40_s15 = ssub.s32 %s2351_s23, %s3698_s26  ;;  %p52_p13 = scmp.eq.s32.totalorder %s2359_s25, 0 }
  0x25   : > { %p37_p0 = scmp.ge.s32.totalorder %s3700_s9, 2  ;;  %p2505_p3 = por %p2449_p2, %p51_p12 }
  0x26   : > { %p2509_p5 = por %p52_p13, %p51_p12  ;;  %p1984_p7 = scmp.lt.s32.totalorder %s2359_s25, 4 }
  0x27   : > { %s3656_s16 = scalar_select %p2505_p3, 1, 0 }
  0x28   : > { %s3702_s9 = smov (%p37_p0, %s3700_s9), 0  ;;  %s234_s7 = sand.u32 1, %s2339_s20  }
  0x29   : > { %3657 = sst [smem:[#allocation19_spill]] %s3656_s16  ;;  %s1787_s8 = sshll.u32 %s2351_s23, 5 }
  0x2a   : > { %s39_s11 = ssub.s32 %s2355_s24, %s3702_s9  ;;  %s1786_s14 = sshll.u32 %s234_s7, 8 }
  0x2b   : > { %s41_s13 = sor.u32 %s40_s15, %s39_s11  ;;  %s1788_s29 = sshll.u32 %s2355_s24, 6 }
  0x2c   : > { %p42_p9 = scmp.eq.s32.totalorder %s41_s13, 0  ;;  %s238_s17 = scalar_lea.vmem [#allocation2], %s1786_s14 }
  0x2d   : > { %s248_s1 = sshll.u32 %s238_s17, 4  ;;  %s243_s3 = sadd.s32 %s1788_s29, %s1787_s8  ;;  %s249_s1 = int_to_ptr.vmem [resolvable:$true] %s248_s1 }
  0x2e   : > { %s2522_s2 = scalar_select %p42_p9, %s2339_s20, %s44_s12  }
  0x2f   : > { %s1789_s26 = sshll.u32 %s243_s3, 3  ;;  %p1974_p2 = pnand %p1984_p7, %p2509_p5 }
  0x30   : > { %s245_s16 = scalar_lea.hbm %s3628_s0, %s1789_s26  ;;  %s235_s15 = scalar_lea.sflag [#allocation3], %s234_s7 }
  0x31   : > { %s246_s23 = sshll.u32 %s245_s16, 4  ;;  %s2366_s11 = smov 128   ;;  %s247_s23 = int_to_ptr.hbm [resolvable:$true] %s246_s23 }
  0x32   : > { %s2367_s13 = smov 8   ;;  %260 = sbr.rel (%p2468_p8) target bundleno = 903 (0x387), region = 40 }
  0x33   : > { %1976 = dma.hbm_to_vmem [thread:$0]  (!%p1974_p2), %s247_s23, 4096, %s249_s1, %s235_s15, %s2366_s11, %s2366_s11, %s2367_s13  }
  0x34   : > { %s2534_s12 = sand.u32 (!%p2468_p8), 1, %s2335_s19  }
  0x35   : > { %s1791_s3 = sshll.u32 (!%p2468_p8), %s2534_s12, 8  ;;  %s263_s27 = scalar_lea.sflag (!%p2468_p8), [#allocation3], %s2534_s12 }
  0x36   : > { %s2538_s8 = scalar_lea.vmem (!%p2468_p8), [#allocation2], %s1791_s3 }
  0x37   : > { %2314 = dma.done.wait (%p2455_p4), %s263_s27, 4096  }
  0x38   : > { %2316 = vsyncadd (%p2455_p4), %s263_s27, 4294963200 }
  0x39   : > { %2318 = dma.done.wait (%p2445_p1), [#allocation6], 32  }
  0x3a   : > { %2320 = vsyncadd (%p2445_p1), [#allocation6], 4294967264 }
  0x3b   : > { %2322 = dma.done.wait (%p2445_p1), [#allocation9], 3072  }
  0x3c   : > { %2324 = vsyncadd (%p2445_p1), [#allocation9], 4294964224  ;;  %v335_v0 = vld [vmem:[%s2538_s8 + $0xc0] sm:$0xff]  ;;  %v313_v2 = vld [vmem:[%s2538_s8 + $0x10] sm:$0xff]  ;;  %v2368_v14 = vmov 128.0   ;;  %s1944_s23 = smul.u32 384, %s2534_s12 }
  0x3d   : > { %v311_v1 = vld [vmem:[%s2538_s8] sm:$0xff]  ;;  %393 = vadd.xlane.f32.xlu1 %v335_v0  ;;  %349 = vadd.xlane.f32.xlu2 %v313_v2  ;;  %v336_v3 = vld [vmem:[%s2538_s8 + $0xc8] sm:$0xff]  ;;  %v2558_v5 = vld [vmem:[%s2538_s8 + $0x18] sm:$0xff]  ;;  %2065 = vrcp.f32 %v2368_v14  ;;  %s1945_s30 = smul.u32 96, %s2343_s21  ;;  %s1642_s17 = scalar_lea.sflag [#allocation4], %s2534_s12 }
  0x3e   : > { %345 = vadd.xlane.f32.xlu0 %v311_v1  ;;  %v312_v4 = vld [vmem:[%s2538_s8 + $0x8] sm:$0xff]  ;;  %v338_v6 = vld [vmem:[%s2538_s8 + $0xd8] sm:$0xff]  ;;  %v2563_v7 = vld [vmem:[%s2538_s8 + $0xd0] sm:$0xff]  ;;  %s3189_s28 = scalar_lea.vmem [#allocation10], %s1944_s23  ;;  %s1946_s6 = smul.u32 192, %s2347_s22 }
  0x3f   : > { %v2566_v8 = vld [vmem:[%s2538_s8 + $0x20] sm:$0xff]  ;;  %v2574_v10 = vld [vmem:[%s2538_s8 + $0x28] sm:$0xff]  ;;  %v2583_v12 = vld [vmem:[%s2538_s8 + $0x30] sm:$0xff]  ;;  %s1657_s14 = sshll.u32 %s3189_s28, 4  ;;  %s2273_s27 = scalar_lea.hbm %s3633_s5, 1536  ;;  %s1658_s14 = int_to_ptr.vmem [resolvable:$true] %s1657_s14 }
  0x40   : > { %v2571_v9 = vld [vmem:[%s2538_s8 + $0xe0] sm:$0xff]  ;;  %v2577_v11 = vld [vmem:[%s2538_s8 + $0xe8] sm:$0xff]  ;;  %v2586_v13 = vld [vmem:[%s2538_s8 + $0x38] sm:$0xff]  ;;  %s1654_s10 = sadd.s32 %s1946_s6, %s1945_s30 }
  0x41   : > { %v2623_v49 = vld [vmem:[%s2538_s8 + $0xf0] sm:$0xff]  ;;  %v2629_v52 = vld [vmem:[%s2538_s8 + $0xf8] sm:$0xff]  ;;  %s1893_s21 = sshll.u32 %s1654_s10, 2 }
  0x42   : > { %s1656_s7 = scalar_lea.hbm %s3633_s5, %s1893_s21 }
  0x43   : > { %v2066_v15 = vpop.eup %2065  ;;  %s1659_s29 = sshll.u32 %s1656_s7, 4  ;;  %s1660_s29 = int_to_ptr.hbm [resolvable:$true] %s1659_s29 }
  0x44   : > { %v410_v16 = vmul.f32 128.0, %v2066_v15  ;;  %vm414_vm0 = vweird.f32 %v2066_v15  ;;  %s2267_s15 = sshra.s32 %s1660_s29, 4  ;;  %s2268_s15 = int_to_ptr.hbm [resolvable:$true] %s2267_s15 }
  0x45   : > { %395 = vadd.xlane.f32.xlu1 %v336_v3  ;;  %351 = vadd.xlane.f32.xlu2 %v2558_v5  ;;  %s2269_s11 = scalar_lea.hbm %s2268_s15, 384  ;;  %p2274_p10 = scmp.lt.s32.totalorder %s2268_s15, %s3633_s5 }
  0x46   : > { %347 = vadd.xlane.f32.xlu0 %v312_v4  ;;  %v411_v17 = vsub.f32 1.0, %v410_v16  ;;  %p2270_p1 = scmp.ne.s32.totalorder %s2268_s15, %s2269_s11  ;;  %p2275_p11 = scmp.lt.s32.totalorder %s2273_s27, %s2269_s11 }
  0x48   : > { %v412_v18 = vmul.f32 %v2066_v15, %v411_v17  ;;  %v2685_v17 = vld [vmem:[%s2538_s8 + $0x58] sm:$0xff]  ;;  %p2271_p4 = pnand %p2270_p1, %p2505_p3  ;;  %p2276_p12 = por %p2275_p11, %p2274_p10 }
  0x4a   : > { %v413_v19 = vadd.f32 %v2066_v15, %v412_v18  ;;  %p2272_p8 = pneg %p2271_p4 }
  0x4c   : > { %v2590_v20 = vsel %vm414_vm0, %v2066_v15, %v413_v19  ;;  %p2277_p13 = pnand %p2276_p12, %p2272_p8 }
  0x4d   : > { %399 = vadd.xlane.f32.xlu1 %v338_v6  ;;  %353 = vadd.xlane.f32.xlu2 %v2566_v8 }
  0x4e   : > { %397 = vadd.xlane.f32.xlu0 %v2563_v7 }
  0x55   : > { %401 = vadd.xlane.f32.xlu1 %v2571_v9  ;;  %403 = vadd.xlane.f32.xlu2 %v2577_v11 }
  0x56   : > { %355 = vadd.xlane.f32.xlu0 %v2574_v10 }
  0x5d   : > { %357 = vadd.xlane.f32.xlu1 %v2583_v12  ;;  %359 = vadd.xlane.f32.xlu2 %v2586_v13 }
  0xb0   : > { %v394_v21 = vpop.xlane.xlu1 %393  ;;  %v350_v25 = vpop.xlane.xlu2 %349 }
  0xb1   : > { %v346_v22 = vpop.xlane.xlu0 %345  ;;  %v440_v23 = vmul.f32 %v2590_v20, %v394_v21  ;;  %v418_v28 = vmul.f32 %v2590_v20, %v350_v25  ;;  %v2695_v21 = vld [vmem:[%s2538_s8 + $0x60] sm:$0xff] }
  0xb2   : > { %v416_v24 = vmul.f32 %v2590_v20, %v346_v22  ;;  %v1881_v22 = vld [vmem:[#allocation8 + $0xa8] sm:$0xf] }
  0xb3   : > { %v2594_v26 = vsub.f32 %v335_v0, %v440_v23  ;;  %v2603_v31 = vsub.f32 %v313_v2, %v418_v28  ;;  %v1918_v23 = vld [vmem:[#allocation8 + $0xb0] sm:$0xf0]  ;;  %v1883_v28 = vld [vmem:[#allocation8 + $0xb4] sm:$0xf0] }
  0xb4   : > { %v2596_v27 = vsub.f32 %v311_v1, %v416_v24  ;;  %v1917_v24 = vld [vmem:[#allocation8 + $0xac] sm:$0xf]  ;;  %v1882_v25 = vor.u32 %v1918_v23, %v1881_v22  ;;  %v1907_v22 = vld [vmem:[#allocation8 + $0x58] sm:$0xf0] }
  0xb5   : > { %v504_v29 = vmul.f32 %v2594_v26, %v2594_v26  ;;  %v482_v39 = vmul.f32 %v2603_v31, %v2603_v31 }
  0xb6   : > { %v480_v30 = vmul.f32 %v2596_v27, %v2596_v27  ;;  %1246 = vmatpush.bf16.msra.mxu0 %v1882_v25  ;;  %1920 = vmatpush.bf16.msra.mxu3 %v1882_v25  ;;  %v1821_v25 = vld [vmem:[#allocation8 + $0x30] sm:$0xf] }
  0xb7   : > { %560 = vadd.xlane.f32.xlu2 %v504_v29  ;;  %v1889_v29 = vld [vmem:[#allocation8 + $0xb0] sm:$0xf] }
  0xb8   : > { %512 = vadd.xlane.f32.xlu0 %v480_v30  ;;  %v396_v32 = vpop.xlane.xlu1 %395  ;;  %v352_v36 = vpop.xlane.xlu2 %351  ;;  %v1919_v30 = vld [vmem:[#allocation8 + $0xb8] sm:$0xf0] }
  0xb9   : > { %v348_v33 = vpop.xlane.xlu0 %347  ;;  %v441_v34 = vmul.f32 %v2590_v20, %v396_v32  ;;  %v419_v47 = vmul.f32 %v2590_v20, %v352_v36  ;;  %v2698_v32 = vor.u32 %v1917_v24, %v1883_v28  ;;  %v1903_v28 = vld [vmem:[#allocation8 + $0x38] sm:$0xf0] }
  0xba   : > { %v417_v35 = vmul.f32 %v2590_v20, %v348_v33  ;;  %v1869_v33 = vld [vmem:[#allocation8 + $0x90] sm:$0xf] }
  0xbb   : > { %v2607_v37 = vsub.f32 %v336_v3, %v441_v34  ;;  %v2632_v53 = vsub.f32 %v2558_v5, %v419_v47  ;;  %v2658_v5 = vld [vmem:[%s2538_s8 + $0x40] sm:$0xff]  ;;  %1335 = vmatpush.bf16.msra.mxu1 %v2698_v32 }
  0xbc   : > { %v2609_v38 = vsub.f32 %v312_v4, %v417_v35  ;;  %v1915_v34 = vld [vmem:[#allocation8 + $0x98] sm:$0xf0]  ;;  %v1914_v35 = vld [vmem:[#allocation8 + $0x94] sm:$0xf] }
  0xbd   : > { %v505_v40 = vmul.f32 %v2607_v37, %v2607_v37  ;;  %v483_v59 = vmul.f32 %v2632_v53, %v2632_v53  ;;  %v1870_v36 = vor.u32 %v1915_v34, %v1869_v33  ;;  %v1911_v47 = vld [vmem:[#allocation8 + $0x7c] sm:$0xf]  ;;  %v1823_v33 = vld [vmem:[#allocation8 + $0x3c] sm:$0xf0]  ;;  %v1829_v34 = vld [vmem:[#allocation8 + $0x38] sm:$0xf] }
  0xbe   : > { %v481_v41 = vmul.f32 %v2609_v38, %v2609_v38 }
  0xbf   : > { %516 = vadd.xlane.f32.xlu2 %v482_v39  ;;  %v1871_v39 = vld [vmem:[#allocation8 + $0x9c] sm:$0xf0]  ;;  %1247 = vmatpush.bf16.msra.mxu0 %v1870_v36 }
  0xc0   : > { %562 = vadd.xlane.f32.xlu0 %v505_v40  ;;  %514 = vadd.xlane.f32.xlu1 %v481_v41  ;;  %v400_v42 = vpop.xlane.xlu1 %399  ;;  %v354_v44 = vpop.xlane.xlu2 %353  ;;  %v1877_v40 = vld [vmem:[#allocation8 + $0x98] sm:$0xf]  ;;  %v1916_v41 = vld [vmem:[#allocation8 + $0xa0] sm:$0xf0] }
  0xc1   : > { %v443_v43 = vmul.f32 %v2590_v20, %v400_v42  ;;  %v398_v45 = vpop.xlane.xlu0 %397  ;;  %v420_v48 = vmul.f32 %v2590_v20, %v354_v44  ;;  %v2704_v42 = vor.u32 %v1914_v35, %v1871_v39  ;;  %1921 = vmatpush.bf16.msra.mxu3 %v1870_v36  ;;  %v1857_v44 = vld [vmem:[#allocation8 + $0x78] sm:$0xf]  ;;  %v1904_v35 = vld [vmem:[#allocation8 + $0x40] sm:$0xf0] }
  0xc2   : > { %v442_v50 = vmul.f32 %v2590_v20, %v398_v45  ;;  %v1912_v45 = vld [vmem:[#allocation8 + $0x80] sm:$0xf0]  ;;  %v2730_v39 = vor.u32 %v1904_v35, %v1829_v34 }
  0xc3   : > { %v2618_v46 = vsub.f32 %v338_v6, %v443_v43  ;;  %v2636_v54 = vsub.f32 %v2566_v8, %v420_v48  ;;  %v2661_v6 = vld [vmem:[%s2538_s8 + $0x48] sm:$0xff]  ;;  %v2706_v43 = vor.u32 %v1916_v41, %v1877_v40  ;;  %1336 = vmatpush.bf16.msra.mxu1 %v2704_v42  ;;  %v1858_v48 = vor.u32 %v1912_v45, %v1857_v44 }
  0xc4   : > { %v2640_v55 = vsub.f32 %v2563_v7, %v442_v50  ;;  %v1859_v50 = vld [vmem:[#allocation8 + $0x84] sm:$0xf0] }
  0xc5   : > { %v507_v51 = vmul.f32 %v2618_v46, %v2618_v46  ;;  %v484_v58 = vmul.f32 %v2636_v54, %v2636_v54  ;;  %1248 = vmatpush.bf16.msra.mxu0 %v1858_v48  ;;  %1922 = vmatpush.bf16.msra.mxu3 %v1858_v48  ;;  %v1900_v48 = vld [vmem:[#allocation8 + $0x20] sm:$0xf0] }
  0xc6   : > { %v506_v61 = vmul.f32 %v2640_v55, %v2640_v55 }
  0xc7   : > { %566 = vadd.xlane.f32.xlu2 %v507_v51  ;;  %v1865_v51 = vld [vmem:[#allocation8 + $0x80] sm:$0xf] }
  0xc8   : > { %405 = vadd.xlane.f32.xlu0 %v2623_v49  ;;  %407 = vadd.xlane.f32.xlu1 %v2629_v52  ;;  %v402_v56 = vpop.xlane.xlu1 %401  ;;  %v404_v57 = vpop.xlane.xlu2 %403 }
  0xc9   : > { %v445_v60 = vmul.f32 %v2590_v20, %v404_v57  ;;  %v356_v0 = vpop.xlane.xlu0 %355  ;;  %v444_v4 = vmul.f32 %v2590_v20, %v402_v56  ;;  %v1913_v56 = vld [vmem:[#allocation8 + $0x88] sm:$0xf0]  ;;  %v2710_v57 = vor.u32 %v1911_v47, %v1859_v50  ;;  %v1809_v47 = vld [vmem:[#allocation8 + $0x18] sm:$0xf]  ;;  %v1899_v50 = vld [vmem:[#allocation8 + $0x1c] sm:$0xf] }
  0xca   : > { %v421_v3 = vmul.f32 %v2590_v20, %v356_v0  ;;  %v1847_v0 = vld [vmem:[#allocation8 + $0x6c] sm:$0xf0] }
  0xcb   : > { %v2650_v62 = vsub.f32 %v2577_v11, %v445_v60  ;;  %v2671_v11 = vsub.f32 %v2571_v9, %v444_v4  ;;  %v2682_v9 = vld [vmem:[%s2538_s8 + $0x50] sm:$0xff]  ;;  %1337 = vmatpush.bf16.msra.mxu1 %v2710_v57 }
  0xcc   : > { %v2668_v8 = vsub.f32 %v2574_v10, %v421_v3  ;;  %v1909_v60 = vld [vmem:[#allocation8 + $0x68] sm:$0xf0] }
  0xcd   : > { %v509_v1 = vmul.f32 %v2650_v62, %v2650_v62  ;;  %v508_v16 = vmul.f32 %v2671_v11, %v2671_v11 }
  0xce   : > { %v485_v15 = vmul.f32 %v2668_v8, %v2668_v8 }
  0xcf   : > { %520 = vadd.xlane.f32.xlu2 %v484_v58  ;;  %v2712_v58 = vor.u32 %v1913_v56, %v1865_v51  ;;  %v1810_v51 = vor.u32 %v1900_v48, %v1809_v47  ;;  %v1811_v56 = vld [vmem:[#allocation8 + $0x24] sm:$0xf0] }
  0xd0   : > { %518 = vadd.xlane.f32.xlu0 %v483_v59  ;;  %564 = vadd.xlane.f32.xlu1 %v506_v61  ;;  %v358_v63 = vpop.xlane.xlu1 %357  ;;  %v360_v10 = vpop.xlane.xlu2 %359  ;;  %v1845_v59 = vld [vmem:[#allocation8 + $0x60] sm:$0xf]  ;;  %v1908_v61 = vld [vmem:[#allocation8 + $0x64] sm:$0xf] }
  0xd1   : > { %v422_v2 = vmul.f32 %v2590_v20, %v358_v63  ;;  %v1846_v63 = vor.u32 %v1909_v60, %v1845_v59  ;;  %v2716_v3 = vor.u32 %v1908_v61, %v1847_v0  ;;  %v1817_v59 = vld [vmem:[#allocation8 + $0x20] sm:$0xf]  ;;  %v1901_v0 = vld [vmem:[#allocation8 + $0x28] sm:$0xf0] }
  0xd3   : > { %v2665_v7 = vsub.f32 %v2583_v12, %v422_v2  ;;  %v423_v12 = vmul.f32 %v2590_v20, %v360_v10  ;;  %v1910_v2 = vld [vmem:[#allocation8 + $0x70] sm:$0xf0]  ;;  %1249 = vmatpush.bf16.msra.mxu0 %v1846_v63  ;;  %1923 = vmatpush.bf16.msra.mxu3 %v1846_v63  ;;  %v2740_v63 = vor.u32 %v1899_v50, %v1811_v56 }
  0xd4   : > { %1338 = vmatpush.bf16.msra.mxu1 %v2716_v3 }
  0xd5   : > { %v486_v14 = vmul.f32 %v2665_v7, %v2665_v7  ;;  %v2689_v18 = vsub.f32 %v2586_v13, %v423_v12  ;;  %v2700_v13 = vor.u32 %v1919_v30, %v1889_v29  ;;  %v1835_v12 = vld [vmem:[#allocation8 + $0x54] sm:$0xf0]  ;;  %v1902_v29 = vld [vmem:[#allocation8 + $0x34] sm:$0xf]  ;;  %v1822_v30 = vor.u32 %v1903_v28, %v1821_v25 }
  0xd6   : > { %v2728_v36 = vor.u32 %v1902_v29, %v1823_v33 }
  0xd7   : > { %570 = vadd.xlane.f32.xlu2 %v509_v1  ;;  %v487_v19 = vmul.f32 %v2689_v18, %v2689_v18  ;;  %1424 = vmatpush.bf16.msra.mxu2 %v2700_v13  ;;  %v1853_v1 = vld [vmem:[#allocation8 + $0x68] sm:$0xf] }
  0xd8   : > { %361 = vadd.xlane.f32.xlu0 %v2658_v5  ;;  %363 = vadd.xlane.f32.xlu1 %v2661_v6  ;;  %v2718_v4 = vor.u32 %v1910_v2, %v1853_v1  ;;  %v2742_v1 = vor.u32 %v1901_v0, %v1817_v59  ;;  %v1797_v2 = vld [vmem:[#allocation8] sm:$0xf] }
  0xdb   : > { %1425 = vmatpush.bf16.msra.mxu2 %v2706_v43 }
  0xdf   : > { %524 = vadd.xlane.f32.xlu2 %v486_v14  ;;  %1426 = vmatpush.bf16.msra.mxu2 %v2712_v58  ;;  %v1833_v14 = vld [vmem:[#allocation8 + $0x48] sm:$0xf] }
  0xe0   : > { %522 = vadd.xlane.f32.xlu0 %v485_v15  ;;  %568 = vadd.xlane.f32.xlu1 %v508_v16  ;;  %v1906_v15 = vld [vmem:[#allocation8 + $0x50] sm:$0xf0]  ;;  %v1905_v16 = vld [vmem:[#allocation8 + $0x4c] sm:$0xf] }
  0xe1   : > { %v1834_v10 = vor.u32 %v1906_v15, %v1833_v14  ;;  %v2722_v23 = vor.u32 %v1905_v16, %v1835_v12  ;;  %v1897_v14 = vld [vmem:[#allocation8 + $0x8] sm:$0xf0]  ;;  %v1896_v15 = vld [vmem:[#allocation8 + $0x4] sm:$0xf]  ;;  %v1805_v12 = vld [vmem:[#allocation8 + $0x8] sm:$0xf] }
  0xe2   : > { %v1798_v16 = vor.u32 %v1897_v14, %v1797_v2 }
  0xe3   : > { %1427 = vmatpush.bf16.msra.mxu2 %v2718_v4  ;;  %1250 = vmatpush.bf16.msra.mxu0 %v1834_v10 }
  0xe4   : > { %1924 = vmatpush.bf16.msra.mxu3 %v1834_v10  ;;  %1339 = vmatpush.bf16.msra.mxu1 %v2722_v23  ;;  %v1799_v10 = vld [vmem:[#allocation8 + $0xc] sm:$0xf0] }
  0xe7   : > { %1251 = vmatpush.bf16.msra.mxu0 %v1822_v30 }
  0xe8   : > { %365 = vadd.xlane.f32.xlu0 %v2682_v9  ;;  %367 = vadd.xlane.f32.xlu1 %v2685_v17 }
  0xe9   : > { %1925 = vmatpush.bf16.msra.mxu3 %v1822_v30  ;;  %1340 = vmatpush.bf16.msra.mxu1 %v2728_v36 }
  0xeb   : > { %1252 = vmatpush.bf16.msra.mxu0 %v1810_v51 }
  0xed   : > { %1926 = vmatpush.bf16.msra.mxu3 %v1810_v51  ;;  %1341 = vmatpush.bf16.msra.mxu1 %v2740_v63 }
  0xef   : > { %1253 = vmatpush.bf16.msra.mxu0 %v1798_v16 }
  0xf0   : > { %526 = vadd.xlane.f32.xlu0 %v487_v19  ;;  %v1841_v19 = vld [vmem:[#allocation8 + $0x50] sm:$0xf] }
  0xf1   : > { %v2724_v24 = vor.u32 %v1907_v22, %v1841_v19  ;;  %v1898_v19 = vld [vmem:[#allocation8 + $0x10] sm:$0xf0]  ;;  %v2748_v22 = vor.u32 %v1896_v15, %v1799_v10  ;;  %1927 = vmatpush.bf16.msra.mxu3 %v1798_v16 }
  0xf2   : > { %v2750_v25 = vor.u32 %v1898_v19, %v1805_v12 }
  0xf3   : > { %1428 = vmatpush.bf16.msra.mxu2 %v2724_v24  ;;  %1342 = vmatpush.bf16.msra.mxu1 %v2748_v22 }
  0xf5   : > { %1928 = vmatpush.bf16.msrb.mxu3 %v2698_v32 }
  0xf7   : > { %1429 = vmatpush.bf16.msra.mxu2 %v2730_v39 }
  0xf8   : > { %369 = vadd.xlane.f32.xlu0 %v2695_v21 }
  0xf9   : > { %1929 = vmatpush.bf16.msrb.mxu3 %v2704_v42 }
  0xfb   : > { %1430 = vmatpush.bf16.msra.mxu2 %v2742_v1 }
  0xfd   : > { %1930 = vmatpush.bf16.msrb.mxu3 %v2710_v57 }
  0xff   : > { %1431 = vmatpush.bf16.msra.mxu2 %v2750_v25 }
 0x101   : > { %1931 = vmatpush.bf16.msrb.mxu3 %v2716_v3 }
 0x105   : > { %1932 = vmatpush.bf16.msrb.mxu3 %v2722_v23 }
 0x109   : > { %1933 = vmatpush.bf16.msrb.mxu3 %v2728_v36 }
 0x10d   : > { %1934 = vmatpush.bf16.msrb.mxu3 %v2740_v63 }
 0x111   : > { %1935 = vmatpush.bf16.msrb.mxu3 %v2748_v22 }
 0x12a   : > { %v561_v40 = vpop.xlane.xlu2 %560 }
 0x12b   : > { %v513_v41 = vpop.xlane.xlu0 %512  ;;  %v600_v44 = vmul.f32 %v561_v40, %v2590_v20 }
 0x12c   : > { %v576_v45 = vmul.f32 %v513_v41, %v2590_v20 }
 0x12d   : > { %v2736_v60 = vadd.f32 1e-06, %v600_v44 }
 0x12e   : > { %v2738_v61 = vadd.f32 1e-06, %v576_v45 }
 0x12f   : > { %2067 = vrsqrt.f32 %v2736_v60  ;;  %vm886_vm2 = vweird.f32 %v2736_v60 }
 0x130   : > { %2069 = vrsqrt.f32 %v2738_v61  ;;  %vm646_vm3 = vweird.f32 %v2738_v61 }
 0x132   : > { %v517_v28 = vpop.xlane.xlu2 %516 }
 0x133   : > { %v563_v29 = vpop.xlane.xlu0 %562  ;;  %v578_v30 = vmul.f32 %v517_v28, %v2590_v20  ;;  %v515_v33 = vpop.xlane.xlu1 %514 }
 0x134   : > { %v601_v34 = vmul.f32 %v563_v29, %v2590_v20  ;;  %v577_v35 = vmul.f32 %v515_v33, %v2590_v20 }
 0x135   : > { %v2758_v40 = vpop.eup %2067  ;;  %v2760_v41 = vadd.f32 1e-06, %v578_v30 }
 0x136   : > { %v2762_v44 = vadd.f32 1e-06, %v601_v34  ;;  %v2764_v45 = vpop.eup %2069  ;;  %v881_v47 = vmul.f32 %v2758_v40, %v2736_v60  ;;  %v2768_v48 = vadd.f32 1e-06, %v577_v35  ;;  %vm887_vm4 = vweird.f32 %v2758_v40 }
 0x137   : > { %v641_v32 = vmul.f32 %v2764_v45, %v2738_v61  ;;  %2071 = vrsqrt.f32 %v2760_v41  ;;  %vm647_vm1 = vweird.f32 %v2764_v45  ;;  %vm666_vm7 = vweird.f32 %v2760_v41  ;;  %vm2835_vm8 = vmor %vm886_vm2, %vm887_vm4 }
 0x138   : > { %v882_v50 = vmul.f32 %v2758_v40, %v881_v47  ;;  %2073 = vrsqrt.f32 %v2768_v48  ;;  %vm2813_vm5 = vmor %vm646_vm3, %vm647_vm1  ;;  %vm656_vm6 = vweird.f32 %v2768_v48  ;;  %vm896_vm10 = vweird.f32 %v2762_v44 }
 0x139   : > { %v642_v51 = vmul.f32 %v2764_v45, %v641_v32  ;;  %2075 = vrsqrt.f32 %v2762_v44 }
 0x13a   : > { %v883_v56 = vmul.f32 0.5, %v882_v50  ;;  %v567_v59 = vpop.xlane.xlu2 %566 }
 0x13b   : > { %v406_v0 = vpop.xlane.xlu0 %405  ;;  %v643_v2 = vmul.f32 0.5, %v642_v51  ;;  %v603_v14 = vmul.f32 %v567_v59, %v2590_v20  ;;  %v408_v15 = vpop.xlane.xlu1 %407 }
 0x13c   : > { %v446_v16 = vmul.f32 %v2590_v20, %v406_v0  ;;  %v447_v42 = vmul.f32 %v2590_v20, %v408_v15  ;;  %v884_v12 = vsub.f32 1.5, %v883_v56 }
 0x13d   : > { %v2782_v10 = vpop.eup %2071  ;;  %v644_v19 = vsub.f32 1.5, %v643_v2  ;;  %v2784_v28 = vadd.f32 1e-06, %v603_v14 }
 0x13e   : > { %v2786_v29 = vpop.eup %2073  ;;  %v661_v30 = vmul.f32 %v2782_v10, %v2760_v41  ;;  %v2792_v33 = vsub.f32 %v2629_v52, %v447_v42  ;;  %v2801_v47 = vsub.f32 %v2623_v49, %v446_v16  ;;  %v885_v50 = vmul.f32 %v2758_v40, %v884_v12 }
 0x13f   : > { %v2794_v34 = vpop.eup %2075  ;;  %v645_v57 = vmul.f32 %v2764_v45, %v644_v19  ;;  %v651_v35 = vmul.f32 %v2786_v29, %v2768_v48  ;;  %2077 = vrsqrt.f32 %v2784_v28  ;;  %vm657_vm9 = vweird.f32 %v2786_v29 }
 0x140   : > { %v662_v52 = vmul.f32 %v2782_v10, %v661_v30  ;;  %v891_v32 = vmul.f32 %v2794_v34, %v2762_v44  ;;  %v511_v59 = vmul.f32 %v2792_v33, %v2792_v33  ;;  %v510_v15 = vmul.f32 %v2801_v47, %v2801_v47  ;;  %vm658_vm12 = vmor %vm656_vm6, %vm657_vm9 }
 0x141   : > { %v652_v3 = vmul.f32 %v2786_v29, %v651_v35  ;;  %v649_v61 = vsel %vm2813_vm5, %v2764_v45, %v645_v57  ;;  %v889_v23 = vsel %vm2835_vm8, %v2758_v40, %v885_v50  ;;  %vm897_vm11 = vweird.f32 %v2794_v34 }
 0x142   : > { %v663_v51 = vmul.f32 0.5, %v662_v52  ;;  %v892_v56 = vmul.f32 %v2794_v34, %v891_v32  ;;  %v521_v0 = vpop.xlane.xlu2 %520  ;;  %574 = vadd.xlane.f32.xlu2 %v511_v59  ;;  %572 = vadd.xlane.f32.xlu1 %v510_v15  ;;  %v960_v32 = vmul.f32 %v649_v61, %v2596_v27  ;;  %v984_v27 = vmul.f32 %v889_v23, %v2594_v26  ;;  %vm898_vm14 = vmor %vm896_vm10, %vm897_vm11 }
 0x143   : > { %v519_v2 = vpop.xlane.xlu0 %518  ;;  %v653_v14 = vmul.f32 0.5, %v652_v3  ;;  %v580_v16 = vmul.f32 %v521_v0, %v2590_v20  ;;  %v565_v42 = vpop.xlane.xlu1 %564  ;;  %vm667_vm13 = vweird.f32 %v2782_v10  ;;  %vm916_vm15 = vweird.f32 %v2784_v28 }
 0x144   : > { %v579_v12 = vmul.f32 %v519_v2, %v2590_v20  ;;  %v893_v19 = vmul.f32 0.5, %v892_v56  ;;  %v602_v30 = vmul.f32 %v565_v42, %v2590_v20  ;;  %v2855_v56 = vld [vmem:[#allocation5] ss:$0 sm:$0xff]  ;;  %v664_v59 = vsub.f32 1.5, %v663_v51  ;;  %v2881_v2 = vld [vmem:[%s2538_s8 + $0x68] sm:$0xff]  ;;  %vm2911_vm1 = vmor %vm666_vm7, %vm667_vm13 }
 0x145   : > { %v2842_v57 = vpop.eup %2077  ;;  %v654_v35 = vsub.f32 1.5, %v653_v14  ;;  %v2847_v60 = vadd.f32 1e-06, %v580_v16 }
 0x146   : > { %v2849_v52 = vadd.f32 1e-06, %v579_v12  ;;  %v894_v49 = vsub.f32 1.5, %v893_v19  ;;  %v911_v3 = vmul.f32 %v2842_v57, %v2784_v28  ;;  %v2859_v40 = vadd.f32 1e-06, %v602_v30 }
 0x147   : > { %v655_v0 = vmul.f32 %v2786_v29, %v654_v35  ;;  %2079 = vrsqrt.f32 %v2847_v60  ;;  %v2885_v16 = vmul.f32 %v2782_v10, %v664_v59  ;;  %vm917_vm0 = vweird.f32 %v2842_v57  ;;  %v2893_v19 = vld [vmem:[#allocation7] ss:$0 sm:$0xff] }
 0x148   : > { %v895_v50 = vmul.f32 %v2794_v34, %v894_v49  ;;  %v912_v61 = vmul.f32 %v2842_v57, %v911_v3  ;;  %2081 = vrsqrt.f32 %v2849_v52  ;;  %v1019_v30 = vmul.f32 %v2855_v56, %v984_v27  ;;  %vm2932_vm2 = vmor %vm916_vm15, %vm917_vm0 }
 0x149   : > { %v659_v51 = vsel %vm658_vm12, %v2786_v29, %v655_v0  ;;  %2083 = vrsqrt.f32 %v2859_v40  ;;  %v995_v29 = vmul.f32 %v2855_v56, %v960_v32  ;;  %v669_v41 = vsel %vm2911_vm1, %v2782_v10, %v2885_v16 }
 0x14a   : > { %v961_v26 = vmul.f32 %v659_v51, %v2609_v38  ;;  %v899_v36 = vsel %vm898_vm14, %v2794_v34, %v895_v50  ;;  %v913_v48 = vmul.f32 0.5, %v912_v61  ;;  %v571_v14 = vpop.xlane.xlu2 %570  ;;  %371 = vadd.xlane.f32.xlu1 %v2881_v2  ;;  %vm906_vm3 = vweird.f32 %v2859_v40 }
 0x14b   : > { %v362_v15 = vpop.xlane.xlu0 %361  ;;  %v985_v44 = vmul.f32 %v899_v36, %v2607_v37  ;;  %v605_v42 = vmul.f32 %v571_v14, %v2590_v20  ;;  %v364_v12 = vpop.xlane.xlu1 %363  ;;  %v1030_v28 = vadd.f32 %v2893_v19, %v995_v29  ;;  %v1054_v61 = vadd.f32 %v2893_v19, %v1019_v30 }
 0x14c   : > { %v424_v45 = vmul.f32 %v2590_v20, %v362_v15  ;;  %v914_v38 = vsub.f32 1.5, %v913_v48  ;;  %v425_v34 = vmul.f32 %v2590_v20, %v364_v12  ;;  %v996_v63 = vmul.f32 %v2855_v56, %v961_v26 }
 0x14d   : > { %v2896_v23 = vpop.eup %2079  ;;  %v2899_v37 = vadd.f32 1e-06, %v605_v42  ;;  %v1020_v0 = vmul.f32 %v2855_v56, %v985_v44  ;;  %vm676_vm7 = vweird.f32 %v2849_v52  ;;  %vm686_vm9 = vweird.f32 %v2847_v60 }
 0x14e   : > { %v2902_v35 = vsub.f32 %v2658_v5, %v424_v45  ;;  %v2905_v32 = vpop.eup %2081  ;;  %v915_v3 = vmul.f32 %v2842_v57, %v914_v38  ;;  %v681_v59 = vmul.f32 %v2896_v23, %v2847_v60  ;;  %v2919_v5 = vsub.f32 %v2661_v6, %v425_v34 }
 0x14f   : > { %v2922_v27 = vpop.eup %2083  ;;  %v671_v6 = vmul.f32 %v2905_v32, %v2849_v52  ;;  %2085 = vrsqrt.f32 %v2899_v37  ;;  %vm677_vm4 = vweird.f32 %v2905_v32  ;;  %v1031_v48 = vadd.f32 %v2893_v19, %v996_v63  ;;  %v2964_v63 = vld [vmem:[%s2538_s8 + $0x70] sm:$0xff] }
 0x150   : > { %v901_v10 = vmul.f32 %v2922_v27, %v2859_v40  ;;  %v682_v51 = vmul.f32 %v2896_v23, %v681_v59  ;;  %v489_v36 = vmul.f32 %v2919_v5, %v2919_v5  ;;  %v919_v22 = vsel %vm2932_vm2, %v2842_v57, %v915_v3  ;;  %vm678_vm8 = vmor %vm676_vm7, %vm677_vm4 }
 0x151   : > { %v672_v26 = vmul.f32 %v2905_v32, %v671_v6  ;;  %v1055_v15 = vadd.f32 %v2893_v19, %v1020_v0  ;;  %v488_v29 = vmul.f32 %v2902_v35, %v2902_v35  ;;  %v1062_v12 = vpack.c.bf16 %v1031_v48, %v1030_v28 }
 0x152   : > { %v902_v14 = vmul.f32 %v2922_v27, %v901_v10  ;;  %v525_v16 = vpop.xlane.xlu2 %524  ;;  %530 = vadd.xlane.f32.xlu0 %v489_v36  ;;  %vm907_vm5 = vweird.f32 %v2922_v27  ;;  %v683_v59 = vmul.f32 0.5, %v682_v51  ;;  %v962_v10 = vmul.f32 %v669_v41, %v2603_v31  ;;  %373 = vadd.xlane.f32.xlu1 %v2964_v63 }
 0x153   : > { %v523_v44 = vpop.xlane.xlu0 %522  ;;  %v673_v42 = vmul.f32 0.5, %v672_v26  ;;  %v582_v45 = vmul.f32 %v525_v16, %v2590_v20  ;;  %v569_v38 = vpop.xlane.xlu1 %568  ;;  %v2961_v57 = vpack.c.bf16 %v1055_v15, %v1054_v61  ;;  %528 = vadd.xlane.f32.xlu2 %v488_v29  ;;  %1254 = vmatmul.bf16.vlgmr.msra.gmra.mxu0 %v1062_v12  ;;  %vm2981_vm6 = vmor %vm906_vm3, %vm907_vm5  ;;  %v987_v41 = vmul.f32 %v919_v22, %v2618_v46 }
 0x154   : > { %v581_v34 = vmul.f32 %v523_v44, %v2590_v20  ;;  %v903_v30 = vmul.f32 0.5, %v902_v14  ;;  %v604_v49 = vmul.f32 %v569_v38, %v2590_v20  ;;  %1343 = vmatmul.bf16.vlgmr.msra.gmra.mxu1 %v1062_v12  ;;  %1432 = vmatmul.bf16.vlgmr.msra.gmra.mxu2 %v1062_v12  ;;  %v684_v52 = vsub.f32 1.5, %v683_v59  ;;  %v3001_v14 = vld [vmem:[%s2538_s8 + $0x78] sm:$0xff] }
 0x155   : > { %v2967_v3 = vpop.eup %2085  ;;  %v674_v0 = vsub.f32 1.5, %v673_v42  ;;  %v2969_v50 = vadd.f32 1e-06, %v582_v45  ;;  %1314 = vmatmul.bf16.vlgmr.msra.gmra.mxu3 %v2961_v57  ;;  %vm687_vm10 = vweird.f32 %v2896_v23  ;;  %vm936_vm12 = vweird.f32 %v2899_v37 }
 0x156   : > { %v2971_v6 = vadd.f32 1e-06, %v581_v34  ;;  %v904_v28 = vsub.f32 1.5, %v903_v30  ;;  %v931_v61 = vmul.f32 %v2967_v3, %v2899_v37  ;;  %v2989_v31 = vadd.f32 1e-06, %v604_v49  ;;  %1936 = vmatpush.bf16.msra.mxu3 %v2700_v13  ;;  %vm3025_vm11 = vmor %vm686_vm9, %vm687_vm10 }
 0x157   : > { %v675_v26 = vmul.f32 %v2905_v32, %v674_v0  ;;  %2087 = vrsqrt.f32 %v2969_v50  ;;  %v685_v45 = vmul.f32 %v2896_v23, %v684_v52  ;;  %vm937_vm13 = vweird.f32 %v2967_v3 }
 0x158   : > { %v905_v40 = vmul.f32 %v2922_v27, %v904_v28  ;;  %v932_v36 = vmul.f32 %v2967_v3, %v931_v61  ;;  %2089 = vrsqrt.f32 %v2971_v6  ;;  %vm3057_vm14 = vmor %vm936_vm12, %vm937_vm13  ;;  %vm696_vm15 = vweird.f32 %v2971_v6 }
 0x159   : > { %v679_v48 = vsel %vm678_vm8, %v2905_v32, %v675_v26  ;;  %2091 = vrsqrt.f32 %v2989_v31  ;;  %v689_v51 = vsel %vm3025_vm11, %v2896_v23, %v685_v45  ;;  %vm926_vm1 = vweird.f32 %v2989_v31 }
 0x15a   : > { %v909_v46 = vsel %vm2981_vm6, %v2922_v27, %v905_v40  ;;  %v963_v13 = vmul.f32 %v679_v48, %v2632_v53  ;;  %v933_v22 = vmul.f32 0.5, %v932_v36  ;;  %1937 = vmatpush.bf16.msra.mxu3 %v2706_v43  ;;  %v1022_v27 = vmul.f32 %v2855_v56, %v987_v41 }
 0x15b   : > { %v366_v15 = vpop.xlane.xlu0 %365  ;;  %v986_v29 = vmul.f32 %v909_v46, %v2640_v55  ;;  %v368_v16 = vpop.xlane.xlu1 %367  ;;  %375 = vadd.xlane.f32.xlu2 %v3001_v14  ;;  %v997_v53 = vmul.f32 %v2855_v56, %v962_v10  ;;  %vm706_vm5 = vweird.f32 %v2969_v50 }
 0x15c   : > { %v426_v32 = vmul.f32 %v2590_v20, %v366_v15  ;;  %v427_v44 = vmul.f32 %v2590_v20, %v368_v16  ;;  %v998_v42 = vmul.f32 %v2855_v56, %v963_v13  ;;  %v934_v55 = vsub.f32 1.5, %v933_v22 }
 0x15d   : > { %v3017_v12 = vpop.eup %2087  ;;  %v1021_v38 = vmul.f32 %v2855_v56, %v986_v29  ;;  %v1057_v61 = vadd.f32 %v2893_v19, %v1022_v27 }
 0x15e   : > { %v2090_v34 = vpop.eup %2089  ;;  %v3031_v30 = vsub.f32 %v2685_v17, %v427_v44  ;;  %v3034_v49 = vsub.f32 %v2682_v9, %v426_v32  ;;  %v1033_v10 = vadd.f32 %v2893_v19, %v998_v42  ;;  %1938 = vmatpush.bf16.msra.mxu3 %v2712_v58  ;;  %v701_v28 = vmul.f32 %v3017_v12, %v2969_v50  ;;  %v3053_v58 = vld [vmem:[%s2538_s8 + $0x80] sm:$0xff] }
 0x15f   : > { %v2092_v59 = vpop.eup %2091  ;;  %v691_v0 = vmul.f32 %v2090_v34, %v2971_v6  ;;  %v1056_v60 = vadd.f32 %v2893_v19, %v1021_v38  ;;  %v1032_v9 = vadd.f32 %v2893_v19, %v997_v53  ;;  %v935_v26 = vmul.f32 %v2967_v3, %v934_v55  ;;  %v3082_v55 = vld [vmem:[%s2538_s8 + $0x88] sm:$0xff]  ;;  %v1110_v50 = vld [vmem:[%s3632_s4] sm:$0x7] }
 0x160   : > { %v921_v17 = vmul.f32 %v2092_v59, %v2989_v31  ;;  %v491_v40 = vmul.f32 %v3031_v30, %v3031_v30  ;;  %v490_v23 = vmul.f32 %v3034_v49, %v3034_v49  ;;  %vm697_vm0 = vweird.f32 %v2090_v34 }
 0x161   : > { %v692_v41 = vmul.f32 %v2090_v34, %v691_v0  ;;  %v3061_v48 = vpack.c.bf16 %v1057_v61, %v1056_v60  ;;  %v1063_v46 = vpack.c.bf16 %v1033_v10, %v1032_v9  ;;  %v702_v37 = vmul.f32 %v3017_v12, %v701_v28  ;;  %vm698_vm3 = vmor %vm696_vm15, %vm697_vm0 }
 0x162   : > { %v922_v52 = vmul.f32 %v2092_v59, %v921_v17  ;;  %534 = vadd.xlane.f32.xlu1 %v491_v40  ;;  %1939 = vmatpush.bf16.msra.mxu3 %v2718_v4  ;;  %vm927_vm2 = vweird.f32 %v2092_v59  ;;  %v939_v16 = vsel %vm3057_vm14, %v2967_v3, %v935_v26  ;;  %v964_v4 = vmul.f32 %v689_v51, %v2636_v54 }
 0x163   : > { %v527_v13 = vpop.xlane.xlu0 %526  ;;  %v693_v22 = vmul.f32 0.5, %v692_v41  ;;  %377 = vadd.xlane.f32.xlu2 %v3053_v58  ;;  %532 = vadd.xlane.f32.xlu0 %v490_v23  ;;  %vm928_vm4 = vmor %vm926_vm1, %vm927_vm2  ;;  %v989_v3 = vmul.f32 %v939_v16, %v2650_v62  ;;  %v703_v53 = vmul.f32 0.5, %v702_v37  ;;  %vm707_vm6 = vweird.f32 %v3017_v12  ;;  %v3111_v41 = vld [vmem:[%s2538_s8 + $0x90] sm:$0xff]  ;;  %v3122_v23 = vld [vmem:[%s2538_s8 + $0x98] sm:$0xff] }
 0x164   : > { %v583_v15 = vmul.f32 %v527_v13, %v2590_v20  ;;  %v923_v29 = vmul.f32 0.5, %v922_v52  ;;  %1259 = vmatmul.bf16.gmra.mxu0 %v1063_v46  ;;  %1348 = vmatmul.bf16.gmra.mxu1 %v1063_v46  ;;  %v999_v60 = vmul.f32 %v2855_v56, %v964_v4  ;;  %vm3106_vm7 = vmor %vm706_vm5, %vm707_vm6 }
 0x165   : > { %v694_v32 = vsub.f32 1.5, %v693_v22  ;;  %1319 = vmatmul.bf16.gmra.mxu3 %v3061_v48  ;;  %1437 = vmatmul.bf16.gmra.mxu2 %v1063_v46 }
 0x166   : > { %v615_v44 = vadd.f32 1e-06, %v583_v15  ;;  %v924_v27 = vsub.f32 1.5, %v923_v29  ;;  %1940 = vmatpush.bf16.msra.mxu3 %v2724_v24  ;;  %v704_v24 = vsub.f32 1.5, %v703_v53  ;;  %v1034_v28 = vadd.f32 %v2893_v19, %v999_v60  ;;  %v3131_v29 = vld [vmem:[%s2538_s8 + $0xa0] sm:$0xff] }
 0x167   : > { %v695_v31 = vmul.f32 %v2090_v34, %v694_v32 }
 0x168   : > { %2093 = vrsqrt.f32 %v615_v44  ;;  %v925_v42 = vmul.f32 %v2092_v59, %v924_v27  ;;  %vm716_vm8 = vweird.f32 %v615_v44 }
 0x169   : > { %v699_v45 = vsel %vm698_vm3, %v2090_v34, %v695_v31  ;;  %v1024_v34 = vmul.f32 %v2855_v56, %v989_v3 }
 0x16a   : > { %v929_v38 = vsel %vm928_vm4, %v2092_v59, %v925_v42  ;;  %v965_v6 = vmul.f32 %v699_v45, %v2668_v8  ;;  %1941 = vmatpush.bf16.msra.mxu3 %v2730_v39 }
 0x16b   : > { %v370_v43 = vpop.xlane.xlu0 %369  ;;  %v988_v0 = vmul.f32 %v929_v38, %v2671_v11  ;;  %379 = vadd.xlane.f32.xlu0 %v3082_v55  ;;  %v1059_v51 = vadd.f32 %v2893_v19, %v1024_v34 }
 0x16c   : > { %v428_v54 = vmul.f32 %v2590_v20, %v370_v43  ;;  %v1000_v62 = vmul.f32 %v2855_v56, %v965_v6 }
 0x16d   : > { %v1023_v11 = vmul.f32 %v2855_v56, %v988_v0 }
 0x16e   : > { %v2094_v10 = vpop.eup %2093  ;;  %v3093_v8 = vsub.f32 %v2695_v21, %v428_v54  ;;  %v1035_v39 = vadd.f32 %v2893_v19, %v1000_v62  ;;  %1942 = vmatpush.bf16.msra.mxu3 %v2742_v1  ;;  %v705_v21 = vmul.f32 %v3017_v12, %v704_v24 }
 0x16f   : > { %v711_v59 = vmul.f32 %v2094_v10, %v615_v44  ;;  %v1058_v17 = vadd.f32 %v2893_v19, %v1023_v11  ;;  %vm717_vm9 = vweird.f32 %v2094_v10 }
 0x170   : > { %v492_v61 = vmul.f32 %v3093_v8, %v3093_v8  ;;  %v1064_v26 = vpack.c.bf16 %v1035_v39, %v1034_v28  ;;  %v709_v1 = vsel %vm3106_vm7, %v3017_v12, %v705_v21  ;;  %vm718_vm10 = vmor %vm716_vm8, %vm717_vm9 }
 0x171   : > { %v712_v9 = vmul.f32 %v2094_v10, %v711_v59  ;;  %v3113_v36 = vpack.c.bf16 %v1059_v51, %v1058_v17  ;;  %v966_v13 = vmul.f32 %v709_v1, %v2665_v7 }
 0x172   : > { %536 = vadd.xlane.f32.xlu1 %v492_v61  ;;  %1943 = vmatpush.bf16.msra.mxu3 %v2750_v25 }
 0x173   : > { %v713_v40 = vmul.f32 0.5, %v712_v9  ;;  %381 = vadd.xlane.f32.xlu0 %v3111_v41  ;;  %v1001_v12 = vmul.f32 %v2855_v56, %v966_v13 }
 0x174   : > { %1264 = vmatmul.bf16.gmra.mxu0 %v1064_v26  ;;  %1353 = vmatmul.bf16.gmra.mxu1 %v1064_v26 }
 0x175   : > { %v714_v52 = vsub.f32 1.5, %v713_v40  ;;  %1324 = vmatmul.bf16.gmra.mxu3 %v3113_v36  ;;  %1442 = vmatmul.bf16.gmra.mxu2 %v1064_v26  ;;  %v1036_v16 = vadd.f32 %v2893_v19, %v1001_v12  ;;  %v3164_v12 = vperm.slane %v1110_v50, 1 }
 0x177   : > { %v715_v46 = vmul.f32 %v2094_v10, %v714_v52 }
 0x179   : > { %v719_v25 = vsel %vm718_vm10, %v2094_v10, %v715_v46 }
 0x17a   : > { %v967_v22 = vmul.f32 %v719_v25, %v2689_v18  ;;  %383 = vadd.xlane.f32.xlu1 %v3122_v23 }
 0x17c   : > { %v1002_v15 = vmul.f32 %v2855_v56, %v967_v22  ;;  %v3162_v22 = vperm.slane %v1110_v50, 0 }
 0x17e   : > { %v1037_v37 = vadd.f32 %v2893_v19, %v1002_v15 }
 0x180   : > { %v1065_v32 = vpack.c.bf16 %v1037_v37, %v1036_v16 }
 0x182   : > { %385 = vadd.xlane.f32.xlu1 %v3131_v29 }
 0x184   : > { %1269 = vmatmul.bf16.gmra.mxu0 %v1065_v32  ;;  %1358 = vmatmul.bf16.gmra.mxu1 %v1065_v32 }
 0x185   : > { %1447 = vmatmul.bf16.gmra.mxu2 %v1065_v32 }
 0x1b5   : > { %v575_v7 = vpop.xlane.xlu2 %574  ;;  %v573_v44 = vpop.xlane.xlu1 %572 }
 0x1b6   : > { %v607_v18 = vmul.f32 %v575_v7, %v2590_v20  ;;  %v606_v27 = vmul.f32 %v573_v44, %v2590_v20 }
 0x1b8   : > { %v639_v4 = vadd.f32 1e-06, %v607_v18  ;;  %v638_v31 = vadd.f32 1e-06, %v606_v27 }
 0x1ba   : > { %2095 = vrsqrt.f32 %v639_v4  ;;  %vm956_vm11 = vweird.f32 %v639_v4  ;;  %vm946_vm15 = vweird.f32 %v638_v31 }
 0x1bb   : > { %2097 = vrsqrt.f32 %v638_v31 }
 0x1bd   : > { %v372_v3 = vpop.xlane.xlu1 %371 }
 0x1be   : > { %v429_v53 = vmul.f32 %v2590_v20, %v372_v3 }
 0x1c0   : > { %v2096_v42 = vpop.eup %2095  ;;  %v3139_v6 = vsub.f32 %v2881_v2, %v429_v53 }
 0x1c1   : > { %v2098_v45 = vpop.eup %2097  ;;  %v951_v38 = vmul.f32 %v2096_v42, %v639_v4  ;;  %vm957_vm12 = vweird.f32 %v2096_v42 }
 0x1c2   : > { %v941_v43 = vmul.f32 %v2098_v45, %v638_v31  ;;  %v493_v54 = vmul.f32 %v3139_v6, %v3139_v6  ;;  %vm947_vm13 = vweird.f32 %v2098_v45  ;;  %vm958_vm14 = vmor %vm956_vm11, %vm957_vm12 }
 0x1c3   : > { %v952_v0 = vmul.f32 %v2096_v42, %v951_v38  ;;  %vm948_vm0 = vmor %vm946_vm15, %vm947_vm13  ;;  %v3181_v38 = vperm.slane %v1110_v50, 2 }
 0x1c4   : > { %v942_v60 = vmul.f32 %v2098_v45, %v941_v43  ;;  %538 = vadd.xlane.f32.xlu2 %v493_v54  ;;  %v3187_v54 = vld [vmem:[%s2538_s8 + $0xa8] sm:$0xff] }
 0x1c5   : > { %v531_v24 = vpop.xlane.xlu0 %530  ;;  %v953_v62 = vmul.f32 0.5, %v952_v0  ;;  %v374_v17 = vpop.xlane.xlu1 %373 }
 0x1c6   : > { %v529_v34 = vpop.xlane.xlu2 %528  ;;  %v585_v10 = vmul.f32 %v531_v24, %v2590_v20  ;;  %v943_v11 = vmul.f32 0.5, %v942_v60  ;;  %v430_v9 = vmul.f32 %v2590_v20, %v374_v17 }
 0x1c7   : > { %v584_v59 = vmul.f32 %v529_v34, %v2590_v20  ;;  %v954_v39 = vsub.f32 1.5, %v953_v62 }
 0x1c8   : > { %v3145_v2 = vadd.f32 1e-06, %v585_v10  ;;  %v944_v28 = vsub.f32 1.5, %v943_v11  ;;  %v3156_v40 = vsub.f32 %v2964_v63, %v430_v9 }
 0x1c9   : > { %v3147_v61 = vadd.f32 1e-06, %v584_v59  ;;  %v955_v21 = vmul.f32 %v2096_v42, %v954_v39 }
 0x1ca   : > { %2099 = vrsqrt.f32 %v3145_v2  ;;  %v945_v51 = vmul.f32 %v2098_v45, %v944_v28  ;;  %v494_v13 = vmul.f32 %v3156_v40, %v3156_v40  ;;  %vm736_vm1 = vweird.f32 %v3145_v2 }
 0x1cb   : > { %2101 = vrsqrt.f32 %v3147_v61  ;;  %v959_v26 = vsel %vm958_vm14, %v2096_v42, %v955_v21  ;;  %vm726_vm5 = vweird.f32 %v3147_v61 }
 0x1cc   : > { %v991_v1 = vmul.f32 %v959_v26, %v2792_v33  ;;  %v949_v52 = vsel %vm948_vm0, %v2098_v45, %v945_v51  ;;  %540 = vadd.xlane.f32.xlu2 %v494_v13 }
 0x1cd   : > { %v990_v46 = vmul.f32 %v949_v52, %v2801_v47 }
 0x1ce   : > { %v376_v25 = vpop.xlane.xlu2 %375  ;;  %v1026_v37 = vmul.f32 %v2855_v56, %v991_v1 }
 0x1cf   : > { %v431_v15 = vmul.f32 %v2590_v20, %v376_v25  ;;  %v1025_v33 = vmul.f32 %v2855_v56, %v990_v46 }
 0x1d0   : > { %v2100_v63 = vpop.eup %2099  ;;  %v1255_v7 = vpop.f32.mrf.mxu0  ;;  %v1061_v44 = vadd.f32 %v2893_v19, %v1026_v37 }
 0x1d1   : > { %v2102_v16 = vpop.eup %2101  ;;  %v731_v47 = vmul.f32 %v2100_v63, %v3145_v2  ;;  %v3172_v32 = vsub.f32 %v3001_v14, %v431_v15  ;;  %v1344_v18 = vpop.f32.mrf.mxu1  ;;  %v1256_v4 = vadd.f32 %v1255_v7, %v3162_v22  ;;  %v1060_v53 = vadd.f32 %v2893_v19, %v1025_v33  ;;  %v3223_v7 = vld [vmem:[%s2538_s8 + $0xb0] sm:$0xff] }
 0x1d2   : > { %v721_v27 = vmul.f32 %v2102_v16, %v3147_v61  ;;  %v1345_v31 = vadd.f32 %v1344_v18, %v3164_v12  ;;  %vm737_vm2 = vweird.f32 %v2100_v63  ;;  %vm727_vm3 = vweird.f32 %v2102_v16 }
 0x1d3   : > { %v732_v3 = vmul.f32 %v2100_v63, %v731_v47  ;;  %v495_v42 = vmul.f32 %v3172_v32, %v3172_v32  ;;  %v3184_v0 = vpack.c.bf16 %v1061_v44, %v1060_v53  ;;  %vm3199_vm4 = vmor %vm736_vm1, %vm737_vm2 }
 0x1d4   : > { %v722_v45 = vmul.f32 %v2102_v16, %v721_v27  ;;  %v1513_v14 = vpack.c.bf16 %v1345_v31, %v1256_v4  ;;  %387 = vadd.xlane.f32.xlu2 %v3187_v54  ;;  %vm728_vm6 = vmor %vm726_vm5, %vm727_vm3 }
 0x1d5   : > { %v733_v43 = vmul.f32 0.5, %v732_v3  ;;  %542 = vadd.xlane.f32.xlu0 %v495_v42  ;;  %v535_v60 = vpop.xlane.xlu1 %534  ;;  %1329 = vmatmul.bf16.gmra.mxu3 %v3184_v0 }
 0x1d6   : > { %v723_v24 = vmul.f32 0.5, %v722_v45  ;;  %1577 = vst [vmem:[%s3189_s28] sm:$0xff] %v1513_v14  ;;  %v587_v62 = vmul.f32 %v535_v60, %v2590_v20  ;;  %v378_v34 = vpop.xlane.xlu2 %377  ;;  %v533_v10 = vpop.xlane.xlu0 %532 }
 0x1d7   : > { %v734_v11 = vsub.f32 1.5, %v733_v43  ;;  %v432_v59 = vmul.f32 %v2590_v20, %v378_v34  ;;  %v586_v39 = vmul.f32 %v533_v10, %v2590_v20  ;;  %v1433_v21 = vpop.f32.mrf.mxu2 }
 0x1d8   : > { %v724_v28 = vsub.f32 1.5, %v723_v24  ;;  %v3204_v9 = vadd.f32 1e-06, %v587_v62  ;;  %v1434_v50 = vadd.f32 %v1433_v21, %v3181_v38  ;;  %v1257_v1 = vpop.f32.mrf.mxu0 }
 0x1d9   : > { %v735_v51 = vmul.f32 %v2100_v63, %v734_v11  ;;  %v3208_v26 = vsub.f32 %v3053_v58, %v432_v59  ;;  %v1346_v52 = vpop.f32.mrf.mxu1  ;;  %v3212_v46 = vadd.f32 1e-06, %v586_v39  ;;  %v1258_v58 = vadd.f32 %v1257_v1, %v3162_v22  ;;  %v3245_v39 = vld [vmem:[%s2538_s8 + $0xb8] sm:$0xff] }
 0x1da   : > { %v725_v2 = vmul.f32 %v2102_v16, %v724_v28  ;;  %2103 = vrsqrt.f32 %v3204_v9  ;;  %v1514_v25 = vpack.c.bf16 %v1434_v50, %v1434_v50  ;;  %v1347_v15 = vadd.f32 %v1346_v52, %v3164_v12 }
 0x1db   : > { %v739_v13 = vsel %vm3199_vm4, %v2100_v63, %v735_v51  ;;  %2105 = vrsqrt.f32 %v3212_v46  ;;  %v496_v18 = vmul.f32 %v3208_v26, %v3208_v26  ;;  %vm756_vm7 = vweird.f32 %v3204_v9 }
 0x1dc   : > { %v729_v37 = vsel %vm728_vm6, %v2102_v16, %v725_v2  ;;  %v969_v33 = vmul.f32 %v739_v13, %v2919_v5  ;;  %1578 = vst [vmem:[%s3189_s28 + $0x8] sm:$0xf] %v1514_v25  ;;  %v1515_v47 = vpack.c.bf16 %v1347_v15, %v1258_v58  ;;  %389 = vadd.xlane.f32.xlu2 %v3223_v7  ;;  %vm746_vm9 = vweird.f32 %v3212_v46 }
 0x1dd   : > { %v968_v61 = vmul.f32 %v729_v37, %v2902_v35  ;;  %544 = vadd.xlane.f32.xlu0 %v496_v18 }
 0x1de   : > { %v380_v63 = vpop.xlane.xlu0 %379  ;;  %v1004_v44 = vmul.f32 %v2855_v56, %v969_v33  ;;  %1579 = vst [vmem:[%s3189_s28 + $0xc] sm:$0xff] %v1515_v47 }
 0x1df   : > { %v433_v16 = vmul.f32 %v2590_v20, %v380_v63  ;;  %v1003_v5 = vmul.f32 %v2855_v56, %v968_v61  ;;  %v1435_v35 = vpop.f32.mrf.mxu2 }
 0x1e0   : > { %v2104_v27 = vpop.eup %2103  ;;  %v1039_v4 = vadd.f32 %v2893_v19, %v1004_v44  ;;  %v1436_v3 = vadd.f32 %v1435_v35, %v3181_v38 }
 0x1e1   : > { %v751_v31 = vmul.f32 %v2104_v27, %v3204_v9  ;;  %v1260_v53 = vpop.f32.mrf.mxu0  ;;  %v1349_v42 = vpop.f32.mrf.mxu1  ;;  %v3236_v14 = vsub.f32 %v3082_v55, %v433_v16  ;;  %v1038_v24 = vadd.f32 %v2893_v19, %v1003_v5  ;;  %vm757_vm8 = vweird.f32 %v2104_v27 }
 0x1e2   : > { %v2106_v45 = vpop.eup %2105  ;;  %v1261_v43 = vadd.f32 %v1260_v53, %v3162_v22  ;;  %v1350_v60 = vadd.f32 %v1349_v42, %v3164_v12  ;;  %v1516_v10 = vpack.c.bf16 %v1436_v3, %v1436_v3  ;;  %vm3258_vm11 = vmor %vm756_vm7, %vm757_vm8 }
 0x1e3   : > { %v752_v62 = vmul.f32 %v2104_v27, %v751_v31  ;;  %v741_v34 = vmul.f32 %v2106_v45, %v3212_v46  ;;  %v1066_v28 = vpack.c.bf16 %v1039_v4, %v1038_v24  ;;  %v497_v55 = vmul.f32 %v3236_v14, %v3236_v14 }
 0x1e4   : > { %v1517_v59 = vpack.c.bf16 %v1350_v60, %v1261_v43  ;;  %1580 = vst [vmem:[%s3189_s28 + $0x14] sm:$0xf] %v1516_v10  ;;  %vm747_vm10 = vweird.f32 %v2106_v45 }
 0x1e5   : > { %v3242_v11 = vpop.xlane.xlu1 %536  ;;  %v753_v17 = vmul.f32 0.5, %v752_v62  ;;  %v742_v21 = vmul.f32 %v2106_v45, %v741_v34  ;;  %1274 = vmatmul.bf16.gmra.mxu0 %v1066_v28  ;;  %1363 = vmatmul.bf16.gmra.mxu1 %v1066_v28  ;;  %vm748_vm12 = vmor %vm746_vm9, %vm747_vm10 }
 0x1e6   : > { %1581 = vst [vmem:[%s3189_s28 + $0x18] sm:$0xff] %v1517_v59  ;;  %v382_v51 = vpop.xlane.xlu0 %381  ;;  %1403 = vmatmul.bf16.vlgmr.msrb.gmra.mxu3 %v2961_v57  ;;  %391 = vadd.xlane.f32.xlu0 %v3245_v39 }
 0x1e7   : > { %v754_v50 = vsub.f32 1.5, %v753_v17  ;;  %v743_v1 = vmul.f32 0.5, %v742_v21  ;;  %v434_v52 = vmul.f32 %v2590_v20, %v382_v51  ;;  %1452 = vmatmul.bf16.gmra.mxu2 %v1066_v28  ;;  %546 = vadd.xlane.f32.xlu1 %v497_v55 }
 0x1e8   : > { %v1438_v13 = vpop.f32.mrf.mxu2 }
 0x1e9   : > { %v755_v25 = vmul.f32 %v2104_v27, %v754_v50  ;;  %v744_v58 = vsub.f32 1.5, %v743_v1  ;;  %v1439_v15 = vadd.f32 %v1438_v13, %v3181_v38  ;;  %v1262_v37 = vpop.f32.mrf.mxu0  ;;  %v1351_v33 = vpop.f32.mrf.mxu1  ;;  %v3266_v9 = vsub.f32 %v3111_v41, %v434_v52 }
 0x1ea   : > { %v1263_v61 = vadd.f32 %v1262_v37, %v3162_v22  ;;  %v1352_v47 = vadd.f32 %v1351_v33, %v3164_v12 }
 0x1eb   : > { %v759_v18 = vsel %vm3258_vm11, %v2104_v27, %v755_v25  ;;  %v745_v63 = vmul.f32 %v2106_v45, %v744_v58  ;;  %v1518_v44 = vpack.c.bf16 %v1439_v15, %v1439_v15  ;;  %v498_v46 = vmul.f32 %v3266_v9, %v3266_v9 }
 0x1ec   : > { %v971_v5 = vmul.f32 %v759_v18, %v3031_v30  ;;  %v1519_v35 = vpack.c.bf16 %v1352_v47, %v1263_v61 }
 0x1ed   : > { %v384_v16 = vpop.xlane.xlu1 %383  ;;  %v749_v41 = vsel %vm748_vm12, %v2106_v45, %v745_v63  ;;  %1582 = vst [vmem:[%s3189_s28 + $0x20] sm:$0xf] %v1518_v44 }
 0x1ee   : > { %v435_v4 = vmul.f32 %v2590_v20, %v384_v16  ;;  %v970_v31 = vmul.f32 %v749_v41, %v3034_v49  ;;  %1583 = vst [vmem:[%s3189_s28 + $0x24] sm:$0xff] %v1519_v35  ;;  %v1006_v27 = vmul.f32 %v2855_v56, %v971_v5 }
 0x1ef   : > { %548 = vadd.xlane.f32.xlu1 %v498_v46 }
 0x1f0   : > { %v3280_v3 = vsub.f32 %v3122_v23, %v435_v4  ;;  %v1440_v53 = vpop.f32.mrf.mxu2  ;;  %v1005_v42 = vmul.f32 %v2855_v56, %v970_v31  ;;  %v1041_v45 = vadd.f32 %v2893_v19, %v1006_v27 }
 0x1f1   : > { %v1441_v43 = vadd.f32 %v1440_v53, %v3181_v38  ;;  %v1265_v49 = vpop.f32.mrf.mxu0  ;;  %v1354_v60 = vpop.f32.mrf.mxu1 }
 0x1f2   : > { %v499_v30 = vmul.f32 %v3280_v3, %v3280_v3  ;;  %v1266_v23 = vadd.f32 %v1265_v49, %v3162_v22  ;;  %v1355_v24 = vadd.f32 %v1354_v60, %v3164_v12  ;;  %v1040_v62 = vadd.f32 %v2893_v19, %v1005_v42  ;;  %v3319_v53 = vpop.f32.mrf.mxu3 }
 0x1f3   : > { %v1520_v34 = vpack.c.bf16 %v1441_v43, %v1441_v43 }
 0x1f4   : > { %550 = vadd.xlane.f32.xlu2 %v499_v30  ;;  %v1521_v59 = vpack.c.bf16 %v1355_v24, %v1266_v23  ;;  %v1067_v28 = vpack.c.bf16 %v1041_v45, %v1040_v62  ;;  %v588_v30 = vmul.f32 %v3242_v11, %v2590_v20 }
 0x1f5   : > { %v386_v10 = vpop.xlane.xlu1 %385  ;;  %1584 = vst [vmem:[%s3189_s28 + $0x2c] sm:$0xf] %v1520_v34 }
 0x1f6   : > { %v436_v55 = vmul.f32 %v2590_v20, %v386_v10  ;;  %1585 = vst [vmem:[%s3189_s28 + $0x30] sm:$0xff] %v1521_v59  ;;  %1279 = vmatmul.bf16.gmra.mxu0 %v1067_v28  ;;  %1368 = vmatmul.bf16.gmra.mxu1 %v1067_v28  ;;  %v620_v42 = vadd.f32 1e-06, %v588_v30  ;;  %v3353_v30 = vld [vmem:[#allocation7] ss:$0 sm:$0xff] }
 0x1f7   : > { %1408 = vmatmul.bf16.gmra.mxu3 %v3061_v48  ;;  %1457 = vmatmul.bf16.gmra.mxu2 %v1067_v28 }
 0x1f8   : > { %v3295_v56 = vsub.f32 %v3131_v29, %v436_v55  ;;  %v1443_v17 = vpop.f32.mrf.mxu2  ;;  %2107 = vrsqrt.f32 %v620_v42  ;;  %vm766_vm13 = vweird.f32 %v620_v42 }
 0x1f9   : > { %v1444_v21 = vadd.f32 %v1443_v17, %v3181_v38  ;;  %v1267_v51 = vpop.f32.mrf.mxu0  ;;  %v1356_v50 = vpop.f32.mrf.mxu1 }
 0x1fa   : > { %v500_v19 = vmul.f32 %v3295_v56, %v3295_v56  ;;  %v1268_v1 = vadd.f32 %v1267_v51, %v3162_v22  ;;  %v1357_v52 = vadd.f32 %v1356_v50, %v3164_v12  ;;  %v3324_v45 = vpop.f32.mrf.mxu3 }
 0x1fb   : > { %v1522_v29 = vpack.c.bf16 %v1444_v21, %v1444_v21 }
 0x1fc   : > { %552 = vadd.xlane.f32.xlu0 %v500_v19  ;;  %v1523_v2 = vpack.c.bf16 %v1357_v52, %v1268_v1 }
 0x1fd   : > { %1586 = vst [vmem:[%s3189_s28 + $0x38] sm:$0xf] %v1522_v29 }
 0x1fe   : > { %1587 = vst [vmem:[%s3189_s28 + $0x3c] sm:$0xff] %v1523_v2  ;;  %v2108_v43 = vpop.eup %2107 }
 0x1ff   : > { %v761_v60 = vmul.f32 %v2108_v43, %v620_v42  ;;  %vm767_vm14 = vweird.f32 %v2108_v43 }
 0x200   : > { %v1445_v13 = vpop.f32.mrf.mxu2  ;;  %vm768_vm15 = vmor %vm766_vm13, %vm767_vm14 }
 0x201   : > { %v1446_v25 = vadd.f32 %v1445_v13, %v3181_v38  ;;  %v1270_v58 = vpop.f32.mrf.mxu0  ;;  %v1359_v15 = vpop.f32.mrf.mxu1  ;;  %v762_v23 = vmul.f32 %v2108_v43, %v761_v60 }
 0x202   : > { %v1271_v37 = vadd.f32 %v1270_v58, %v3162_v22  ;;  %v1360_v33 = vadd.f32 %v1359_v15, %v3164_v12  ;;  %v3326_v49 = vpop.f32.mrf.mxu3 }
 0x203   : > { %v1524_v61 = vpack.c.bf16 %v1446_v25, %v1446_v25  ;;  %v763_v10 = vmul.f32 0.5, %v762_v23 }
 0x204   : > { %v1525_v47 = vpack.c.bf16 %v1360_v33, %v1271_v37 }
 0x205   : > { %1588 = vst [vmem:[%s3189_s28 + $0x44] sm:$0xf] %v1524_v61 }
 0x206   : > { %1589 = vst [vmem:[%s3189_s28 + $0x48] sm:$0xff] %v1525_v47 }
 0x207   : > { %1413 = vmatmul.bf16.gmra.mxu3 %v3113_v36 }
 0x208   : > { %v1448_v18 = vpop.f32.mrf.mxu2 }
 0x209   : > { %v1449_v63 = vadd.f32 %v1448_v18, %v3181_v38  ;;  %v1272_v44 = vpop.f32.mrf.mxu0  ;;  %v1361_v16 = vpop.f32.mrf.mxu1 }
 0x20a   : > { %v1273_v5 = vadd.f32 %v1272_v44, %v3162_v22  ;;  %v1362_v35 = vadd.f32 %v1361_v16, %v3164_v12  ;;  %v3330_v59 = vpop.f32.mrf.mxu3  ;;  %v3345_v44 = vld [vmem:[#allocation5] ss:$0 sm:$0xff] }
 0x20b   : > { %v1526_v46 = vpack.c.bf16 %v1449_v63, %v1449_v63 }
 0x20c   : > { %v1527_v4 = vpack.c.bf16 %v1362_v35, %v1273_v5 }
 0x20d   : > { %1590 = vst [vmem:[%s3189_s28 + $0x50] sm:$0xf] %v1526_v46 }
 0x20e   : > { %1591 = vst [vmem:[%s3189_s28 + $0x54] sm:$0xff] %v1527_v4 }
 0x210   : > { %v1450_v41 = vpop.f32.mrf.mxu2 }
 0x211   : > { %v1451_v31 = vadd.f32 %v1450_v41, %v3181_v38 }
 0x212   : > { %v3334_v51 = vpop.f32.mrf.mxu3 }
 0x213   : > { %v1528_v27 = vpack.c.bf16 %v1451_v31, %v1451_v31 }
 0x215   : > { %1592 = vst [vmem:[%s3189_s28 + $0x5c] sm:$0xf] %v1528_v27 }
 0x217   : > { %1418 = vmatmul.bf16.gmra.mxu3 %v3184_v0 }
 0x21a   : > { %v3348_v5 = vpop.f32.mrf.mxu3 }
 0x227   : > { %1492 = vmatmul.bf16.vlgmr.msra.gmra.mxu3 %v2961_v57  ;;  %v764_v57 = vsub.f32 1.5, %v763_v10 }
 0x229   : > { %v765_v17 = vmul.f32 %v2108_v43, %v764_v57 }
 0x22b   : > { %v769_v1 = vsel %vm768_vm15, %v2108_v43, %v765_v17 }
 0x22c   : > { %v972_v58 = vmul.f32 %v769_v1, %v3093_v8 }
 0x22e   : > { %v1007_v8 = vmul.f32 %v3345_v44, %v972_v58 }
 0x230   : > { %v1042_v42 = vadd.f32 %v3353_v30, %v1007_v8 }
 0x237   : > { %1497 = vmatmul.bf16.gmra.mxu3 %v3061_v48  ;;  %v539_v24 = vpop.xlane.xlu2 %538 }
 0x238   : > { %v589_v62 = vmul.f32 %v539_v24, %v2590_v20 }
 0x23a   : > { %v621_v34 = vadd.f32 1e-06, %v589_v62 }
 0x23c   : > { %2109 = vrsqrt.f32 %v621_v34  ;;  %vm776_vm1 = vweird.f32 %v621_v34 }
 0x23f   : > { %v541_v11 = vpop.xlane.xlu2 %540 }
 0x240   : > { %v590_v55 = vmul.f32 %v541_v11, %v2590_v20 }
 0x242   : > { %v2110_v28 = vpop.eup %2109  ;;  %v622_v48 = vadd.f32 1e-06, %v590_v55 }
 0x243   : > { %v771_v19 = vmul.f32 %v2110_v28, %v621_v34  ;;  %vm777_vm0 = vweird.f32 %v2110_v28 }
 0x244   : > { %2111 = vrsqrt.f32 %v622_v48  ;;  %vm778_vm2 = vmor %vm776_vm1, %vm777_vm0  ;;  %vm786_vm4 = vweird.f32 %v622_v48 }
 0x245   : > { %v772_v21 = vmul.f32 %v2110_v28, %v771_v19 }
 0x247   : > { %1502 = vmatmul.bf16.gmra.mxu3 %v3113_v36  ;;  %v773_v52 = vmul.f32 0.5, %v772_v21  ;;  %v388_v13 = vpop.xlane.xlu2 %387 }
 0x248   : > { %v543_v50 = vpop.xlane.xlu0 %542  ;;  %v437_v15 = vmul.f32 %v2590_v20, %v388_v13 }
 0x249   : > { %v591_v29 = vmul.f32 %v543_v50, %v2590_v20  ;;  %v774_v2 = vsub.f32 1.5, %v773_v52 }
 0x24a   : > { %v2112_v36 = vpop.eup %2111  ;;  %v3340_v33 = vsub.f32 %v3187_v54, %v437_v15 }
 0x24b   : > { %v623_v25 = vadd.f32 1e-06, %v591_v29  ;;  %v775_v37 = vmul.f32 %v2110_v28, %v774_v2  ;;  %v781_v47 = vmul.f32 %v2112_v36, %v622_v48  ;;  %vm787_vm3 = vweird.f32 %v2112_v36 }
 0x24c   : > { %v501_v63 = vmul.f32 %v3340_v33, %v3340_v33  ;;  %vm788_vm5 = vmor %vm786_vm4, %vm787_vm3 }
 0x24d   : > { %2113 = vrsqrt.f32 %v623_v25  ;;  %v779_v61 = vsel %vm778_vm2, %v2110_v28, %v775_v37  ;;  %v782_v16 = vmul.f32 %v2112_v36, %v781_v47  ;;  %vm796_vm7 = vweird.f32 %v623_v25 }
 0x24e   : > { %v973_v18 = vmul.f32 %v779_v61, %v3139_v6  ;;  %554 = vadd.xlane.f32.xlu1 %v501_v63 }
 0x24f   : > { %v783_v4 = vmul.f32 0.5, %v782_v16  ;;  %v390_v41 = vpop.xlane.xlu2 %389 }
 0x250   : > { %v545_v35 = vpop.xlane.xlu0 %544  ;;  %v1008_v46 = vmul.f32 %v3345_v44, %v973_v18  ;;  %v438_v27 = vmul.f32 %v2590_v20, %v390_v41 }
 0x251   : > { %v592_v31 = vmul.f32 %v545_v35, %v2590_v20  ;;  %v784_v60 = vsub.f32 1.5, %v783_v4 }
 0x252   : > { %v1043_v43 = vadd.f32 %v3353_v30, %v1008_v46  ;;  %v3360_v62 = vsub.f32 %v3223_v7, %v438_v27 }
 0x253   : > { %v2114_v54 = vpop.eup %2113  ;;  %v3357_v23 = vadd.f32 1e-06, %v592_v31  ;;  %v785_v10 = vmul.f32 %v2112_v36, %v784_v60 }
 0x254   : > { %v791_v6 = vmul.f32 %v2114_v54, %v623_v25  ;;  %v1068_v34 = vpack.c.bf16 %v1043_v43, %v1042_v42  ;;  %v502_v11 = vmul.f32 %v3360_v62, %v3360_v62  ;;  %vm797_vm6 = vweird.f32 %v2114_v54 }
 0x255   : > { %2115 = vrsqrt.f32 %v3357_v23  ;;  %v789_v28 = vsel %vm788_vm5, %v2112_v36, %v785_v10  ;;  %vm798_vm8 = vmor %vm796_vm7, %vm797_vm6  ;;  %vm806_vm10 = vweird.f32 %v3357_v23 }
 0x256   : > { %v792_v24 = vmul.f32 %v2114_v54, %v791_v6  ;;  %1284 = vmatmul.bf16.gmra.mxu0 %v1068_v34  ;;  %1373 = vmatmul.bf16.gmra.mxu1 %v1068_v34  ;;  %v974_v19 = vmul.f32 %v789_v28, %v3156_v40 }
 0x257   : > { %1507 = vmatmul.bf16.gmra.mxu3 %v3184_v0  ;;  %1462 = vmatmul.bf16.gmra.mxu2 %v1068_v34  ;;  %v1316_v34 = vadd.f32 %v3319_v53, %v3162_v22 }
 0x258   : > { %v793_v57 = vmul.f32 0.5, %v792_v24  ;;  %556 = vadd.xlane.f32.xlu2 %v502_v11  ;;  %v3366_v7 = vpop.f32.mrf.mxu3  ;;  %v1009_v15 = vmul.f32 %v3345_v44, %v974_v19 }
 0x259   : > { %v392_v17 = vpop.xlane.xlu0 %391 }
 0x25a   : > { %v794_v55 = vsub.f32 1.5, %v793_v57  ;;  %v547_v48 = vpop.xlane.xlu1 %546  ;;  %v439_v0 = vmul.f32 %v2590_v20, %v392_v17  ;;  %v1044_v18 = vadd.f32 %v3353_v30, %v1009_v15 }
 0x25b   : > { %v593_v50 = vmul.f32 %v547_v48, %v2590_v20  ;;  %v2116_v1 = vpop.eup %2115 }
 0x25c   : > { %v795_v21 = vmul.f32 %v2114_v54, %v794_v55  ;;  %v3372_v52 = vsub.f32 %v3245_v39, %v439_v0  ;;  %v801_v2 = vmul.f32 %v2116_v1, %v3357_v23  ;;  %vm807_vm9 = vweird.f32 %v2116_v1 }
 0x25d   : > { %v625_v13 = vadd.f32 1e-06, %v593_v50  ;;  %vm3397_vm11 = vmor %vm806_vm10, %vm807_vm9 }
 0x25e   : > { %v799_v29 = vsel %vm798_vm8, %v2114_v54, %v795_v21  ;;  %v503_v40 = vmul.f32 %v3372_v52, %v3372_v52  ;;  %v802_v37 = vmul.f32 %v2116_v1, %v801_v2 }
 0x25f   : > { %v975_v58 = vmul.f32 %v799_v29, %v3172_v32  ;;  %2117 = vrsqrt.f32 %v625_v13  ;;  %vm816_vm12 = vweird.f32 %v625_v13 }
 0x260   : > { %558 = vadd.xlane.f32.xlu0 %v503_v40  ;;  %v803_v36 = vmul.f32 0.5, %v802_v37  ;;  %v3380_v61 = vpop.f32.mrf.mxu3 }
 0x261   : > { %v1010_v25 = vmul.f32 %v3345_v44, %v975_v58 }
 0x262   : > { %v549_v39 = vpop.xlane.xlu1 %548  ;;  %v1275_v47 = vpop.f32.mrf.mxu0  ;;  %v804_v32 = vsub.f32 1.5, %v803_v36 }
 0x263   : > { %v1045_v63 = vadd.f32 %v3353_v30, %v1010_v25  ;;  %v594_v8 = vmul.f32 %v549_v39, %v2590_v20  ;;  %v1276_v16 = vadd.f32 %v1275_v47, %v3162_v22  ;;  %v1364_v35 = vpop.f32.mrf.mxu1  ;;  %v1318_v25 = vadd.f32 %v3324_v45, %v3162_v22 }
 0x264   : > { %v1365_v46 = vadd.f32 %v1364_v35, %v3164_v12  ;;  %v805_v27 = vmul.f32 %v2116_v1, %v804_v32 }
 0x265   : > { %v1069_v54 = vpack.c.bf16 %v1045_v63, %v1044_v18  ;;  %v2118_v41 = vpop.eup %2117  ;;  %v3387_v31 = vadd.f32 1e-06, %v594_v8 }
 0x266   : > { %v811_v42 = vmul.f32 %v2118_v41, %v625_v13  ;;  %v1529_v43 = vpack.c.bf16 %v1365_v46, %v1276_v16  ;;  %v809_v11 = vsel %vm3397_vm11, %v2116_v1, %v805_v27  ;;  %vm817_vm13 = vweird.f32 %v2118_v41 }
 0x267   : > { %v551_v4 = vpop.xlane.xlu2 %550  ;;  %2119 = vrsqrt.f32 %v3387_v31  ;;  %1289 = vmatmul.bf16.gmra.mxu0 %v1069_v54  ;;  %1378 = vmatmul.bf16.gmra.mxu1 %v1069_v54  ;;  %v976_v1 = vmul.f32 %v809_v11, %v3208_v26  ;;  %vm818_vm14 = vmor %vm816_vm12, %vm817_vm13  ;;  %vm826_vm15 = vweird.f32 %v3387_v31 }
 0x268   : > { %v595_v6 = vmul.f32 %v551_v4, %v2590_v20  ;;  %v812_v24 = vmul.f32 %v2118_v41, %v811_v42  ;;  %1593 = vst [vmem:[%s3189_s28 + $0x60] sm:$0xff] %v1529_v43  ;;  %1467 = vmatmul.bf16.gmra.mxu2 %v1069_v54  ;;  %v1333_v42 = vadd.f32 %v3380_v61, %v3162_v22 }
 0x269   : > { %v1404_v57 = vpop.f32.mrf.mxu3  ;;  %v1011_v18 = vmul.f32 %v3345_v44, %v976_v1 }
 0x26a   : > { %v3391_v60 = vadd.f32 1e-06, %v595_v6  ;;  %v813_v28 = vmul.f32 0.5, %v812_v24  ;;  %v1405_v23 = vadd.f32 %v1404_v57, %v3164_v12  ;;  %v1453_v55 = vpop.f32.mrf.mxu2  ;;  %v1277_v17 = vpop.f32.mrf.mxu0 }
 0x26b   : > { %v1454_v53 = vadd.f32 %v1453_v55, %v3181_v38  ;;  %v1278_v19 = vadd.f32 %v1277_v17, %v3162_v22  ;;  %v1366_v48 = vpop.f32.mrf.mxu1  ;;  %v1046_v24 = vadd.f32 %v3353_v30, %v1011_v18 }
 0x26c   : > { %2121 = vrsqrt.f32 %v3391_v60  ;;  %v814_v0 = vsub.f32 1.5, %v813_v28  ;;  %v1561_v21 = vpack.c.bf16 %v1405_v23, %v1316_v34  ;;  %v1367_v50 = vadd.f32 %v1366_v48, %v3164_v12 }
 0x26d   : > { %v2120_v29 = vpop.eup %2119  ;;  %v1530_v2 = vpack.c.bf16 %v1454_v53, %v1454_v53  ;;  %vm836_vm0 = vweird.f32 %v3391_v60  ;;  %v1321_v53 = vadd.f32 %v3326_v49, %v3162_v22 }
 0x26e   : > { %v815_v58 = vmul.f32 %v2118_v41, %v814_v0  ;;  %v821_v40 = vmul.f32 %v2120_v29, %v3387_v31  ;;  %1625 = vst [vmem:[%s3189_s28 + $0x120] sm:$0xff] %v1561_v21  ;;  %v1531_v15 = vpack.c.bf16 %v1367_v50, %v1278_v19  ;;  %vm827_vm1 = vweird.f32 %v2120_v29 }
 0x26f   : > { %1594 = vst [vmem:[%s3189_s28 + $0x68] sm:$0xf] %v1530_v2  ;;  %vm3428_vm3 = vmor %vm826_vm15, %vm827_vm1 }
 0x270   : > { %v819_v36 = vsel %vm818_vm14, %v2118_v41, %v815_v58  ;;  %v822_v39 = vmul.f32 %v2120_v29, %v821_v40  ;;  %1595 = vst [vmem:[%s3189_s28 + $0x6c] sm:$0xff] %v1531_v15 }
 0x271   : > { %v977_v26 = vmul.f32 %v819_v36, %v3236_v14  ;;  %v1406_v13 = vpop.f32.mrf.mxu3  ;;  %v1323_v36 = vadd.f32 %v3330_v59, %v3162_v22  ;;  %v1326_v59 = vadd.f32 %v3334_v51, %v3162_v22 }
 0x272   : > { %v2122_v37 = vpop.eup %2121  ;;  %v823_v63 = vmul.f32 0.5, %v822_v39  ;;  %v1407_v8 = vadd.f32 %v1406_v13, %v3164_v12  ;;  %v1455_v45 = vpop.f32.mrf.mxu2 }
 0x273   : > { %v831_v47 = vmul.f32 %v2122_v37, %v3391_v60  ;;  %v1280_v16 = vpop.f32.mrf.mxu0  ;;  %vm837_vm2 = vweird.f32 %v2122_v37  ;;  %v1456_v35 = vadd.f32 %v1455_v45, %v3181_v38  ;;  %v1369_v46 = vpop.f32.mrf.mxu1  ;;  %v1012_v54 = vmul.f32 %v3345_v44, %v977_v26 }
 0x274   : > { %v1281_v14 = vadd.f32 %v1280_v16, %v3162_v22  ;;  %v824_v4 = vsub.f32 1.5, %v823_v63  ;;  %v1563_v6 = vpack.c.bf16 %v1407_v8, %v1318_v25  ;;  %v1370_v27 = vadd.f32 %v1369_v46, %v3164_v12  ;;  %vm3438_vm4 = vmor %vm836_vm0, %vm837_vm2 }
 0x275   : > { %v832_v32 = vmul.f32 %v2122_v37, %v831_v47  ;;  %v1532_v43 = vpack.c.bf16 %v1456_v35, %v1456_v35  ;;  %v1047_v34 = vadd.f32 %v3353_v30, %v1012_v54 }
 0x276   : > { %v825_v10 = vmul.f32 %v2120_v29, %v824_v4  ;;  %1627 = vst [vmem:[%s3189_s28 + $0x12c] sm:$0xff] %v1563_v6  ;;  %v1533_v11 = vpack.c.bf16 %v1370_v27, %v1281_v14  ;;  %v1328_v14 = vadd.f32 %v3348_v5, %v3162_v22 }
 0x277   : > { %v833_v41 = vmul.f32 0.5, %v832_v32  ;;  %1596 = vst [vmem:[%s3189_s28 + $0x74] sm:$0xf] %v1532_v43  ;;  %v1070_v31 = vpack.c.bf16 %v1047_v34, %v1046_v24 }
 0x278   : > { %v829_v23 = vsel %vm3428_vm3, %v2120_v29, %v825_v10  ;;  %1597 = vst [vmem:[%s3189_s28 + $0x78] sm:$0xff] %v1533_v11  ;;  %v553_v10 = vpop.xlane.xlu0 %552 }
 0x279   : > { %v834_v57 = vsub.f32 1.5, %v833_v41  ;;  %1294 = vmatmul.bf16.gmra.mxu0 %v1070_v31  ;;  %1383 = vmatmul.bf16.gmra.mxu1 %v1070_v31  ;;  %v978_v21 = vmul.f32 %v829_v23, %v3266_v9  ;;  %v1331_v41 = vadd.f32 %v3366_v7, %v3162_v22  ;;  %v596_v7 = vmul.f32 %v553_v10, %v2590_v20 }
 0x27a   : > { %v1409_v17 = vpop.f32.mrf.mxu3  ;;  %1472 = vmatmul.bf16.gmra.mxu2 %v1070_v31  ;;  %v1458_v48 = vpop.f32.mrf.mxu2 }
 0x27b   : > { %v835_v55 = vmul.f32 %v2122_v37, %v834_v57  ;;  %v1410_v19 = vadd.f32 %v1409_v17, %v3164_v12  ;;  %v1282_v0 = vpop.f32.mrf.mxu0  ;;  %v1459_v29 = vadd.f32 %v1458_v48, %v3181_v38  ;;  %v1371_v2 = vpop.f32.mrf.mxu1  ;;  %v1013_v9 = vmul.f32 %v3345_v44, %v978_v21 }
 0x27c   : > { %v1283_v1 = vadd.f32 %v1282_v0, %v3162_v22  ;;  %v1372_v58 = vadd.f32 %v1371_v2, %v3164_v12  ;;  %v628_v28 = vadd.f32 1e-06, %v596_v7 }
 0x27d   : > { %v839_v60 = vsel %vm3438_vm4, %v2122_v37, %v835_v55  ;;  %v1565_v49 = vpack.c.bf16 %v1410_v19, %v1321_v53  ;;  %v1534_v40 = vpack.c.bf16 %v1459_v29, %v1459_v29  ;;  %v1048_v13 = vadd.f32 %v3353_v30, %v1013_v9 }
 0x27e   : > { %v979_v50 = vmul.f32 %v839_v60, %v3280_v3  ;;  %v1535_v37 = vpack.c.bf16 %v1372_v58, %v1283_v1  ;;  %2123 = vrsqrt.f32 %v628_v28  ;;  %vm846_vm5 = vweird.f32 %v628_v28 }
 0x27f   : > { %1629 = vst [vmem:[%s3189_s28 + $0x138] sm:$0xff] %v1565_v49 }
 0x280   : > { %v1014_v15 = vmul.f32 %v3345_v44, %v979_v50  ;;  %1598 = vst [vmem:[%s3189_s28 + $0x80] sm:$0xf] %v1534_v40 }
 0x281   : > { %1599 = vst [vmem:[%s3189_s28 + $0x84] sm:$0xff] %v1535_v37 }
 0x282   : > { %v1411_v3 = vpop.f32.mrf.mxu3  ;;  %v1049_v25 = vadd.f32 %v3353_v30, %v1014_v15  ;;  %v1460_v47 = vpop.f32.mrf.mxu2 }
 0x283   : > { %v1412_v39 = vadd.f32 %v1411_v3, %v3164_v12  ;;  %v1461_v26 = vadd.f32 %v1460_v47, %v3181_v38 }
 0x284   : > { %v1071_v32 = vpack.c.bf16 %v1049_v25, %v1048_v13  ;;  %v2124_v17 = vpop.eup %2123 }
 0x285   : > { %v1567_v18 = vpack.c.bf16 %v1412_v39, %v1323_v36  ;;  %v1536_v63 = vpack.c.bf16 %v1461_v26, %v1461_v26  ;;  %v841_v60 = vmul.f32 %v2124_v17, %v628_v28  ;;  %vm847_vm6 = vweird.f32 %v2124_v17 }
 0x286   : > { %vm848_vm7 = vmor %vm846_vm5, %vm847_vm6 }
 0x287   : > { %1631 = vst [vmem:[%s3189_s28 + $0x144] sm:$0xff] %v1567_v18  ;;  %v842_v0 = vmul.f32 %v2124_v17, %v841_v60 }
 0x288   : > { %1600 = vst [vmem:[%s3189_s28 + $0x8c] sm:$0xf] %v1536_v63 }
 0x289   : > { %1299 = vmatmul.bf16.gmra.mxu0 %v1071_v32  ;;  %1388 = vmatmul.bf16.gmra.mxu1 %v1071_v32  ;;  %v843_v1 = vmul.f32 0.5, %v842_v0 }
 0x28a   : > { %v1414_v8 = vpop.f32.mrf.mxu3  ;;  %1477 = vmatmul.bf16.gmra.mxu2 %v1071_v32 }
 0x28b   : > { %v1415_v45 = vadd.f32 %v1414_v8, %v3164_v12  ;;  %v844_v40 = vsub.f32 1.5, %v843_v1 }
 0x28d   : > { %v1569_v16 = vpack.c.bf16 %v1415_v45, %v1326_v59  ;;  %v845_v25 = vmul.f32 %v2124_v17, %v844_v40 }
 0x28f   : > { %1633 = vst [vmem:[%s3189_s28 + $0x150] sm:$0xff] %v1569_v16  ;;  %v849_v18 = vsel %vm848_vm7, %v2124_v17, %v845_v25 }
 0x292   : > { %v1416_v35 = vpop.f32.mrf.mxu3 }
 0x293   : > { %v1417_v46 = vadd.f32 %v1416_v35, %v3164_v12 }
 0x295   : > { %v1571_v54 = vpack.c.bf16 %v1417_v46, %v1328_v14  ;;  %v980_v46 = vmul.f32 %v849_v18, %v3295_v56 }
 0x297   : > { %1635 = vst [vmem:[%s3189_s28 + $0x15c] sm:$0xff] %v1571_v54  ;;  %v1015_v56 = vmul.f32 %v3345_v44, %v980_v46 }
 0x29a   : > { %v1419_v4 = vpop.f32.mrf.mxu3 }
 0x29b   : > { %v1420_v51 = vadd.f32 %v1419_v4, %v3164_v12 }
 0x29d   : > { %v1573_v6 = vpack.c.bf16 %v1420_v51, %v1331_v41 }
 0x29f   : > { %1637 = vst [vmem:[%s3189_s28 + $0x168] sm:$0xff] %v1573_v6 }
 0x2a2   : > { %v1421_v27 = vpop.f32.mrf.mxu3 }
 0x2a3   : > { %v1422_v5 = vadd.f32 %v1421_v27, %v3164_v12 }
 0x2a5   : > { %v1575_v43 = vpack.c.bf16 %v1422_v5, %v1333_v42 }
 0x2a7   : > { %1639 = vst [vmem:[%s3189_s28 + $0x174] sm:$0xff] %v1575_v43 }
 0x2aa   : > { %v1493_v24 = vpop.f32.mrf.mxu3 }
 0x2ab   : > { %v1494_v34 = vadd.f32 %v1493_v24, %v3181_v38 }
 0x2ad   : > { %v1562_v57 = vpack.c.bf16 %v1494_v34, %v1494_v34 }
 0x2af   : > { %1626 = vst [vmem:[%s3189_s28 + $0x128] sm:$0xf] %v1562_v57 }
 0x2b2   : > { %v1495_v11 = vpop.f32.mrf.mxu3 }
 0x2b3   : > { %v1496_v31 = vadd.f32 %v1495_v11, %v3181_v38 }
 0x2b5   : > { %v1564_v23 = vpack.c.bf16 %v1496_v31, %v1496_v31 }
 0x2b7   : > { %1628 = vst [vmem:[%s3189_s28 + $0x134] sm:$0xf] %v1564_v23 }
 0x2ba   : > { %v1498_v61 = vpop.f32.mrf.mxu3 }
 0x2bb   : > { %v1499_v55 = vadd.f32 %v1498_v61, %v3181_v38 }
 0x2bd   : > { %v1566_v53 = vpack.c.bf16 %v1499_v55, %v1499_v55 }
 0x2bf   : > { %1630 = vst [vmem:[%s3189_s28 + $0x140] sm:$0xf] %v1566_v53  ;;  %v1050_v53 = vadd.f32 %v3353_v30, %v1015_v56 }
 0x2c1   : > { %v555_v50 = vpop.xlane.xlu1 %554 }
 0x2c2   : > { %v1500_v19 = vpop.f32.mrf.mxu3  ;;  %v597_v29 = vmul.f32 %v555_v50, %v2590_v20 }
 0x2c3   : > { %v1501_v48 = vadd.f32 %v1500_v19, %v3181_v38 }
 0x2c4   : > { %v629_v2 = vadd.f32 1e-06, %v597_v29 }
 0x2c5   : > { %v1568_v21 = vpack.c.bf16 %v1501_v48, %v1501_v48 }
 0x2c6   : > { %2125 = vrsqrt.f32 %v629_v2  ;;  %vm856_vm9 = vweird.f32 %v629_v2 }
 0x2c7   : > { %1632 = vst [vmem:[%s3189_s28 + $0x14c] sm:$0xf] %v1568_v21 }
 0x2ca   : > { %v1503_v49 = vpop.f32.mrf.mxu3 }
 0x2cb   : > { %v1504_v58 = vadd.f32 %v1503_v49, %v3181_v38  ;;  %v557_v37 = vpop.xlane.xlu2 %556 }
 0x2cc   : > { %v598_v9 = vmul.f32 %v557_v37, %v2590_v20  ;;  %v2126_v3 = vpop.eup %2125 }
 0x2cd   : > { %v1570_v15 = vpack.c.bf16 %v1504_v58, %v1504_v58  ;;  %v851_v39 = vmul.f32 %v2126_v3, %v629_v2  ;;  %vm857_vm8 = vweird.f32 %v2126_v3 }
 0x2ce   : > { %v630_v36 = vadd.f32 1e-06, %v598_v9  ;;  %vm858_vm10 = vmor %vm856_vm9, %vm857_vm8 }
 0x2cf   : > { %1634 = vst [vmem:[%s3189_s28 + $0x158] sm:$0xf] %v1570_v15  ;;  %v852_v26 = vmul.f32 %v2126_v3, %v851_v39 }
 0x2d0   : > { %2127 = vrsqrt.f32 %v630_v36  ;;  %vm866_vm11 = vweird.f32 %v630_v36 }
 0x2d1   : > { %v853_v32 = vmul.f32 0.5, %v852_v26 }
 0x2d2   : > { %v1505_v47 = vpop.f32.mrf.mxu3 }
 0x2d3   : > { %v1506_v13 = vadd.f32 %v1505_v47, %v3181_v38  ;;  %v559_v63 = vpop.xlane.xlu0 %558  ;;  %v1285_v45 = vpop.f32.mrf.mxu0  ;;  %v854_v54 = vsub.f32 1.5, %v853_v32 }
 0x2d4   : > { %v599_v59 = vmul.f32 %v559_v63, %v2590_v20  ;;  %v1374_v16 = vpop.f32.mrf.mxu1  ;;  %v1286_v35 = vadd.f32 %v1285_v45, %v3162_v22 }
 0x2d5   : > { %v1572_v8 = vpack.c.bf16 %v1506_v13, %v1506_v13  ;;  %v1375_v14 = vadd.f32 %v1374_v16, %v3164_v12  ;;  %v855_v6 = vmul.f32 %v2126_v3, %v854_v54 }
 0x2d6   : > { %v631_v4 = vadd.f32 1e-06, %v599_v59  ;;  %v2128_v41 = vpop.eup %2127 }
 0x2d7   : > { %1636 = vst [vmem:[%s3189_s28 + $0x164] sm:$0xf] %v1572_v8  ;;  %v1537_v51 = vpack.c.bf16 %v1375_v14, %v1286_v35  ;;  %v861_v27 = vmul.f32 %v2128_v41, %v630_v36  ;;  %v859_v42 = vsel %vm858_vm10, %v2126_v3, %v855_v6  ;;  %vm867_vm12 = vweird.f32 %v2128_v41 }
 0x2d8   : > { %2129 = vrsqrt.f32 %v631_v4  ;;  %v981_v24 = vmul.f32 %v859_v42, %v3340_v33  ;;  %vm3517_vm13 = vmor %vm866_vm11, %vm867_vm12  ;;  %vm876_vm15 = vweird.f32 %v631_v4 }
 0x2d9   : > { %1601 = vst [vmem:[%s3189_s28 + $0x90] sm:$0xff] %v1537_v51  ;;  %v862_v5 = vmul.f32 %v2128_v41, %v861_v27 }
 0x2da   : > { %v1508_v20 = vpop.f32.mrf.mxu3  ;;  %v1463_v34 = vpop.f32.mrf.mxu2  ;;  %v1016_v61 = vmul.f32 %v3345_v44, %v981_v24 }
 0x2db   : > { %v1509_v43 = vadd.f32 %v1508_v20, %v3181_v38  ;;  %v863_v10 = vmul.f32 0.5, %v862_v5  ;;  %v1464_v7 = vadd.f32 %v1463_v34, %v3181_v38  ;;  %v1287_v11 = vpop.f32.mrf.mxu0 }
 0x2dc   : > { %v1376_v28 = vpop.f32.mrf.mxu1  ;;  %v1288_v31 = vadd.f32 %v1287_v11, %v3162_v22  ;;  %v1051_v48 = vadd.f32 %v3353_v30, %v1016_v61 }
 0x2dd   : > { %v1574_v57 = vpack.c.bf16 %v1509_v43, %v1509_v43  ;;  %v1377_v23 = vadd.f32 %v1376_v28, %v3164_v12  ;;  %v864_v17 = vsub.f32 1.5, %v863_v10  ;;  %v1538_v33 = vpack.c.bf16 %v1464_v7, %v1464_v7 }
 0x2de   : > { %v2130_v55 = vpop.eup %2129  ;;  %v1072_v29 = vpack.c.bf16 %v1051_v48, %v1050_v53 }
 0x2df   : > { %1638 = vst [vmem:[%s3189_s28 + $0x170] sm:$0xf] %v1574_v57  ;;  %v871_v60 = vmul.f32 %v2130_v55, %v631_v4  ;;  %v1539_v19 = vpack.c.bf16 %v1377_v23, %v1288_v31  ;;  %v865_v0 = vmul.f32 %v2128_v41, %v864_v17  ;;  %vm877_vm14 = vweird.f32 %v2130_v55 }
 0x2e0   : > { %1602 = vst [vmem:[%s3189_s28 + $0x98] sm:$0xf] %v1538_v33  ;;  %1304 = vmatmul.bf16.gmra.mxu0 %v1072_v29  ;;  %1393 = vmatmul.bf16.gmra.mxu1 %v1072_v29  ;;  %vm878_vm0 = vmor %vm876_vm15, %vm877_vm14 }
 0x2e1   : > { %v872_v21 = vmul.f32 %v2130_v55, %v871_v60  ;;  %1603 = vst [vmem:[%s3189_s28 + $0x9c] sm:$0xff] %v1539_v19  ;;  %v869_v49 = vsel %vm3517_vm13, %v2128_v41, %v865_v0  ;;  %1482 = vmatmul.bf16.gmra.mxu2 %v1072_v29 }
 0x2e2   : > { %v1510_v50 = vpop.f32.mrf.mxu3  ;;  %v1465_v40 = vpop.f32.mrf.mxu2  ;;  %v982_v47 = vmul.f32 %v869_v49, %v3360_v62 }
 0x2e3   : > { %v1511_v2 = vadd.f32 %v1510_v50, %v3181_v38  ;;  %v873_v58 = vmul.f32 0.5, %v872_v21  ;;  %v1466_v37 = vadd.f32 %v1465_v40, %v3181_v38 }
 0x2e4   : > { %v1290_v9 = vpop.f32.mrf.mxu0  ;;  %v1379_v3 = vpop.f32.mrf.mxu1  ;;  %v1017_v8 = vmul.f32 %v3345_v44, %v982_v47 }
 0x2e5   : > { %v1576_v15 = vpack.c.bf16 %v1511_v2, %v1511_v2  ;;  %v874_v25 = vsub.f32 1.5, %v873_v58  ;;  %v1291_v36 = vadd.f32 %v1290_v9, %v3162_v22  ;;  %v1380_v39 = vadd.f32 %v1379_v3, %v3164_v12 }
 0x2e6   : > { %v1540_v26 = vpack.c.bf16 %v1466_v37, %v1466_v37  ;;  %v1052_v4 = vadd.f32 %v3353_v30, %v1017_v8 }
 0x2e7   : > { %1640 = vst [vmem:[%s3189_s28 + $0x17c] sm:$0xf] %v1576_v15  ;;  %v875_v13 = vmul.f32 %v2130_v55, %v874_v25  ;;  %v1541_v18 = vpack.c.bf16 %v1380_v39, %v1291_v36 }
 0x2e8   : > { %1604 = vst [vmem:[%s3189_s28 + $0xa4] sm:$0xf] %v1540_v26 }
 0x2e9   : > { %v879_v63 = vsel %vm878_vm0, %v2130_v55, %v875_v13  ;;  %1605 = vst [vmem:[%s3189_s28 + $0xa8] sm:$0xff] %v1541_v18 }
 0x2ea   : > { %v983_v32 = vmul.f32 %v879_v63, %v3372_v52 }
 0x2eb   : > { %v1468_v59 = vpop.f32.mrf.mxu2 }
 0x2ec   : > { %v1469_v45 = vadd.f32 %v1468_v59, %v3181_v38  ;;  %v1292_v16 = vpop.f32.mrf.mxu0  ;;  %v1381_v62 = vpop.f32.mrf.mxu1  ;;  %v1018_v35 = vmul.f32 %v3345_v44, %v983_v32 }
 0x2ed   : > { %v1293_v14 = vadd.f32 %v1292_v16, %v3162_v22  ;;  %v1382_v46 = vadd.f32 %v1381_v62, %v3164_v12 }
 0x2ee   : > { %v1542_v54 = vpack.c.bf16 %v1469_v45, %v1469_v45  ;;  %v1053_v41 = vadd.f32 %v3353_v30, %v1018_v35 }
 0x2ef   : > { %v1543_v52 = vpack.c.bf16 %v1382_v46, %v1293_v14 }
 0x2f0   : > { %1606 = vst [vmem:[%s3189_s28 + $0xb0] sm:$0xf] %v1542_v54  ;;  %v1073_v51 = vpack.c.bf16 %v1053_v41, %v1052_v4 }
 0x2f1   : > { %1607 = vst [vmem:[%s3189_s28 + $0xb4] sm:$0xff] %v1543_v52 }
 0x2f2   : > { %1309 = vmatmul.bf16.gmra.mxu0 %v1073_v51  ;;  %1398 = vmatmul.bf16.gmra.mxu1 %v1073_v51 }
 0x2f3   : > { %v1470_v6 = vpop.f32.mrf.mxu2  ;;  %1487 = vmatmul.bf16.gmra.mxu2 %v1073_v51 }
 0x2f4   : > { %v1471_v44 = vadd.f32 %v1470_v6, %v3181_v38 }
 0x2f6   : > { %v1544_v27 = vpack.c.bf16 %v1471_v44, %v1471_v44  ;;  %v1295_v20 = vpop.f32.mrf.mxu0  ;;  %v1384_v42 = vpop.f32.mrf.mxu1 }
 0x2f7   : > { %v1296_v5 = vadd.f32 %v1295_v20, %v3162_v22  ;;  %v1385_v30 = vadd.f32 %v1384_v42, %v3164_v12 }
 0x2f8   : > { %1608 = vst [vmem:[%s3189_s28 + $0xbc] sm:$0xf] %v1544_v27 }
 0x2f9   : > { %v1545_v43 = vpack.c.bf16 %v1385_v30, %v1296_v5 }
 0x2fb   : > { %1609 = vst [vmem:[%s3189_s28 + $0xc0] sm:$0xff] %v1545_v43 }
 0x2fd   : > { %v1473_v56 = vpop.f32.mrf.mxu2 }
 0x2fe   : > { %v1474_v24 = vadd.f32 %v1473_v56, %v3181_v38  ;;  %v1297_v34 = vpop.f32.mrf.mxu0  ;;  %v1386_v10 = vpop.f32.mrf.mxu1 }
 0x2ff   : > { %v1298_v57 = vadd.f32 %v1297_v34, %v3162_v22  ;;  %v1387_v7 = vadd.f32 %v1386_v10, %v3164_v12 }
 0x300   : > { %v1546_v11 = vpack.c.bf16 %v1474_v24, %v1474_v24 }
 0x301   : > { %v1547_v28 = vpack.c.bf16 %v1387_v7, %v1298_v57 }
 0x302   : > { %1610 = vst [vmem:[%s3189_s28 + $0xc8] sm:$0xf] %v1546_v11 }
 0x303   : > { %1611 = vst [vmem:[%s3189_s28 + $0xcc] sm:$0xff] %v1547_v28 }
 0x305   : > { %v1475_v31 = vpop.f32.mrf.mxu2 }
 0x306   : > { %v1476_v23 = vadd.f32 %v1475_v31, %v3181_v38  ;;  %v1300_v61 = vpop.f32.mrf.mxu0  ;;  %v1389_v55 = vpop.f32.mrf.mxu1 }
 0x307   : > { %v1301_v17 = vadd.f32 %v1300_v61, %v3162_v22  ;;  %v1390_v33 = vadd.f32 %v1389_v55, %v3164_v12 }
 0x308   : > { %v1548_v53 = vpack.c.bf16 %v1476_v23, %v1476_v23 }
 0x309   : > { %v1549_v60 = vpack.c.bf16 %v1390_v33, %v1301_v17 }
 0x30a   : > { %1612 = vst [vmem:[%s3189_s28 + $0xd4] sm:$0xf] %v1548_v53 }
 0x30b   : > { %1613 = vst [vmem:[%s3189_s28 + $0xd8] sm:$0xff] %v1549_v60 }
 0x30d   : > { %v1478_v19 = vpop.f32.mrf.mxu2 }
 0x30e   : > { %v1479_v48 = vadd.f32 %v1478_v19, %v3181_v38  ;;  %v1302_v0 = vpop.f32.mrf.mxu0  ;;  %v1391_v21 = vpop.f32.mrf.mxu1 }
 0x30f   : > { %v1303_v50 = vadd.f32 %v1302_v0, %v3162_v22  ;;  %v1392_v29 = vadd.f32 %v1391_v21, %v3164_v12 }
 0x310   : > { %v1550_v1 = vpack.c.bf16 %v1479_v48, %v1479_v48 }
 0x311   : > { %v1551_v2 = vpack.c.bf16 %v1392_v29, %v1303_v50 }
 0x312   : > { %1614 = vst [vmem:[%s3189_s28 + $0xe0] sm:$0xf] %v1550_v1 }
 0x313   : > { %1615 = vst [vmem:[%s3189_s28 + $0xe4] sm:$0xff] %v1551_v2 }
 0x315   : > { %v1480_v49 = vpop.f32.mrf.mxu2 }
 0x316   : > { %v1481_v58 = vadd.f32 %v1480_v49, %v3181_v38 }
 0x318   : > { %v1552_v40 = vpack.c.bf16 %v1481_v58, %v1481_v58 }
 0x31a   : > { %1616 = vst [vmem:[%s3189_s28 + $0xec] sm:$0xf] %v1552_v40 }
 0x35d   : > { %v1305_v15 = vpop.f32.mrf.mxu0  ;;  %v1394_v37 = vpop.f32.mrf.mxu1 }
 0x35e   : > { %v1306_v9 = vadd.f32 %v1305_v15, %v3162_v22  ;;  %v1395_v3 = vadd.f32 %v1394_v37, %v3164_v12 }
 0x360   : > { %v1553_v25 = vpack.c.bf16 %v1395_v3, %v1306_v9 }
 0x362   : > { %1617 = vst [vmem:[%s3189_s28 + $0xf0] sm:$0xff] %v1553_v25 }
 0x364   : > { %v1483_v36 = vpop.f32.mrf.mxu2 }
 0x365   : > { %v1484_v39 = vadd.f32 %v1483_v36, %v3181_v38  ;;  %v1307_v47 = vpop.f32.mrf.mxu0  ;;  %v1396_v26 = vpop.f32.mrf.mxu1 }
 0x366   : > { %v1308_v13 = vadd.f32 %v1307_v47, %v3162_v22  ;;  %v1397_v18 = vadd.f32 %v1396_v26, %v3164_v12 }
 0x367   : > { %v1554_v63 = vpack.c.bf16 %v1484_v39, %v1484_v39 }
 0x368   : > { %v1555_v32 = vpack.c.bf16 %v1397_v18, %v1308_v13 }
 0x369   : > { %1618 = vst [vmem:[%s3189_s28 + $0xf8] sm:$0xf] %v1554_v63 }
 0x36a   : > { %1619 = vst [vmem:[%s3189_s28 + $0xfc] sm:$0xff] %v1555_v32 }
 0x36c   : > { %v1485_v8 = vpop.f32.mrf.mxu2 }
 0x36d   : > { %v1486_v59 = vadd.f32 %v1485_v8, %v3181_v38 }
 0x36f   : > { %v1310_v45 = vpop.f32.mrf.mxu0  ;;  %v1399_v16 = vpop.f32.mrf.mxu1  ;;  %v1556_v14 = vpack.c.bf16 %v1486_v59, %v1486_v59 }
 0x370   : > { %v1311_v62 = vadd.f32 %v1310_v45, %v3162_v22  ;;  %v1400_v35 = vadd.f32 %v1399_v16, %v3164_v12 }
 0x371   : > { %1620 = vst [vmem:[%s3189_s28 + $0x104] sm:$0xf] %v1556_v14 }
 0x372   : > { %v1557_v46 = vpack.c.bf16 %v1400_v35, %v1311_v62 }
 0x374   : > { %1621 = vst [vmem:[%s3189_s28 + $0x108] sm:$0xff] %v1557_v46 }
 0x376   : > { %v1488_v54 = vpop.f32.mrf.mxu2 }
 0x377   : > { %v1489_v4 = vadd.f32 %v1488_v54, %v3181_v38  ;;  %v1312_v41 = vpop.f32.mrf.mxu0  ;;  %v1401_v52 = vpop.f32.mrf.mxu1 }
 0x378   : > { %v1313_v51 = vadd.f32 %v1312_v41, %v3162_v22  ;;  %v1402_v6 = vadd.f32 %v1401_v52, %v3164_v12 }
 0x379   : > { %v1558_v44 = vpack.c.bf16 %v1489_v4, %v1489_v4 }
 0x37a   : > { %v1559_v27 = vpack.c.bf16 %v1402_v6, %v1313_v51 }
 0x37b   : > { %1622 = vst [vmem:[%s3189_s28 + $0x110] sm:$0xf] %v1558_v44 }
 0x37c   : > { %1623 = vst [vmem:[%s3189_s28 + $0x114] sm:$0xff] %v1559_v27 }
 0x37e   : > { %v1490_v20 = vpop.f32.mrf.mxu2 }
 0x37f   : > { %v1491_v42 = vadd.f32 %v1490_v20, %v3181_v38 }
 0x381   : > { %v1560_v22 = vpack.c.bf16 %v1491_v42, %v1491_v42 }
 0x383   : > { %1624 = vst [vmem:[%s3189_s28 + $0x11c] sm:$0xf] %v1560_v22 }
 0x384   : > { %2280 = shalt.err (!%p2277_p13)
}
 0x385   : > { %s2369_s12 = smov 192   ;;  %s2370_s18 = smov 12  }
 0x386   : > { %1961 = dma.vmem_to_hbm [thread:$0]  (%p2505_p3), %s1658_s14, 6144, %s1660_s29, %s1642_s17, %s2369_s12, %s2369_s12, %s2370_s18  }
 0x387 PF: > { %s3688_s23 = sld [smem:[#allocation15_spill]]  ;;  %p1988_p0 = scmp.ge.s32.totalorder %s2359_s25, 2 }
 0x389   : > { %p1978_p5 = pnand %p1988_p0, %p2460_p6 }
 0x38b   : > { %p1979_p7 = pneg %p1978_p5 }
 0x38d   : > { %s1674_s30 = sand.u32 1, %s3688_s23  }
 0x38e   : > { %s1675_s6 = scalar_lea.sflag [#allocation4], %s1674_s30 }
 0x38f   : > { %2326 = dma.done.wait (%p1979_p7), %s1675_s6, 6144  }
 0x390   : > { %2328 = vsyncadd (%p1979_p7), %s1675_s6, 4294961152  ;;  %s23_s25 = sadd.s32 1, %s2359_s25   ;;  %s3690_s21 = sld [smem:[#allocation16_spill]] }
 0x391   : > { %p20_p9 = scmp.ge.s32.totalorder %s23_s25, 6   ;;  %s3691_s23 = sld [smem:[#allocation18_spill]] }
 0x392   : > { %s3692_s18 = smov %s2335_s19  ;;  %s3693_s19 = smov %s2339_s20 }
 0x393   : > { %s3694_s20 = smov %s2522_s2  ;;  %s3695_s22 = smov %s2355_s24 }
 0x394   : > { %s3696_s24 = smov %s3702_s9  ;;  %22 = sbr.rel (!%p20_p9) target bundleno = 13 (0xd), region = 97 }
 0x399   :  { %1681 = vsyncpa [#allocation3], 1 }
 0x39a   :  { %1683 = vsyncpa [#allocation3 + $0x1], 1 }
 0x39b   :  { %1684 = vsyncpa [#allocation6], 1 }
 0x39c   :  { %1685 = vsyncpa [#allocation9], 1 }
 0x39d   :  { %1686 = vsyncpa [#allocation4], 1 }
 0x39e   :  { %1688 = vsyncpa [#allocation4 + $0x1], 1 }

</bundles_post_ra>
